<compile_context>
chip_gen: v7x
topology: tpu7x:2x2x1
jax: 0.10.0
libtpu: 0.0.40
codegen_flags: <defaults>
</compile_context>

<pallas_src>
import jax
import jax.numpy as jnp
from jax.experimental import pallas as pl
from jax.experimental.pallas import tpu as pltpu  # noqa: F401  (kept for TPU-specific tuning)

# ----------------------- small config -----------------------
BATCH = 2
CHANNELS = 4
IMG = 16
PATCH = 4
EMBED = 32
HEADS = 4
DEPTH = 2
MLP_RATIO = 2
NUM_CLASSES = 10

NPATCH = (IMG // PATCH) ** 2          # tokens per image (16)
PD = CHANNELS * PATCH * PATCH         # patch_dim (64)
HS = EMBED // HEADS                   # head size (8)
HM = EMBED * MLP_RATIO                # mlp hidden (64)
SCALE = HS ** -0.5
EPS = 1e-5

ROWS = BATCH * NPATCH                 # 32 token rows processed in one invocation

# ---- packed f32 constant slab ("vecs") row layout, 128 lanes wide ----
VECW = 128
R_LNP_W, R_LNP_B, R_LNE_W, R_LNE_B = 0, 1, 2, 3
R_LAYER = 4                           # + 6*l : ln1_w, ln1_b, ln2_w, ln2_b, b1, b2
R_BHEAD = R_LAYER + 6 * DEPTH         # 16  (b_head, zero-padded to 128 lanes)
R_POS = 24                            # 16 rows of positional embedding (8-aligned start)
R_MASK = R_POS + NPATCH               # 40  (32 rows: per-head block-diagonal {0,1} mask)
VEC_ROWS = R_MASK + EMBED             # 72
assert R_BHEAD + 1 <= R_POS

# ---- packed bf16 "narrow" weight slab (E = 32 lanes wide) row layout ----
A_PE = 0                                         # [PD, E]
A_LAYER_STRIDE = 4 * EMBED + HM                  # wq, wk, wv, wproj, w2 per layer
A_ROWS = PD + DEPTH * A_LAYER_STRIDE             # 448


def a_layer(l):
    return PD + l * A_LAYER_STRIDE


# ---- packed bf16 "wide" weight slab (128 lanes) row layout ----
W_HEAD_ROW = DEPTH * EMBED                       # W1 per layer, then W_head
W_ROWS = DEPTH * EMBED + EMBED                   # 96


# ----------------------- in-kernel helpers -----------------------
def _layernorm(x, w, b):
    # Two independent lane reductions (E[x], E[x^2]) instead of the serial
    # mean -> center -> square -> mean chain.  All f32.
    m1 = jnp.mean(x, axis=-1, keepdims=True)
    m2 = jnp.mean(x * x, axis=-1, keepdims=True)
    rstd = jax.lax.rsqrt(m2 - m1 * m1 + EPS)
    return (x - m1) * rstd * w + b


def _gelu(x):
    # tanh-approximate GELU: the transcendental goes to the EUP; ~1e-3 max deviation
    # from nn.GELU()'s exact erf form (documented, inside the 1e-2 tolerance).
    return 0.5 * x * (1.0 + jnp.tanh(0.7978845608028654 * (x + 0.044715 * x * x * x)))


def _mm(a, b):
    """MXU matmul: bf16 operands, f32 accumulation."""
    return jnp.dot(a.astype(jnp.bfloat16), b.astype(jnp.bfloat16),
                   preferred_element_type=jnp.float32)


# ----------------------- the kernel -----------------------
def vit_kernel(patches_ref, vecs_ref, wa_ref, ww_ref, out_ref):
    # patches_ref: [B*T, PD] f32 (all images stacked along rows)
    x = patches_ref[...]

    # ---- patch embedding: LN(PD) -> Linear(PD, E, no bias) -> LN(E) -> +pos ----
    x = _layernorm(x, vecs_ref[R_LNP_W:R_LNP_W + 1, :PD], vecs_ref[R_LNP_B:R_LNP_B + 1, :PD])
    x = _mm(x, wa_ref[A_PE:A_PE + PD, :])                            # [B*T, E]
    x = _layernorm(x, vecs_ref[R_LNE_W:R_LNE_W + 1, :EMBED], vecs_ref[R_LNE_B:R_LNE_B + 1, :EMBED])
    pos = vecs_ref[R_POS:R_POS + NPATCH, :EMBED]                     # [T, E]
    x = x + jnp.concatenate([pos] * BATCH, axis=0)                   # pos_dropout = identity

    # precomputed per-head block-diagonal {0,1} mask (keeps k_n^T v_n blocks of K^T V)
    mask = vecs_ref[R_MASK:R_MASK + EMBED, :EMBED]                   # [E, E] f32

    for l in range(DEPTH):
        rb = R_LAYER + 6 * l
        ab = a_layer(l)

        # ---- multi-head "attention" (reference applies NO softmax) ----
        h = _layernorm(x, vecs_ref[rb:rb + 1, :EMBED], vecs_ref[rb + 1:rb + 2, :EMBED])
        hb = h.astype(jnp.bfloat16)
        wq = wa_ref[ab:ab + EMBED, :]                                # SCALE folded in
        wk = wa_ref[ab + EMBED:ab + 2 * EMBED, :]
        wv = wa_ref[ab + 2 * EMBED:ab + 3 * EMBED, :]
        wp = wa_ref[ab + 3 * EMBED:ab + 4 * EMBED, :]
        w2 = wa_ref[ab + 4 * EMBED:ab + 4 * EMBED + HM, :]
        q = jnp.dot(hb, wq, preferred_element_type=jnp.float32)      # [B*T, E]
        k = jnp.dot(hb, wk, preferred_element_type=jnp.float32)
        v = jnp.dot(hb, wv, preferred_element_type=jnp.float32)

        # softmax-free => reassociate per head: (q k^T) v == q (k^T v); split per image
        attn_parts = []
        for bi in range(BATCH):
            lo = bi * NPATCH                                         # 0, 16 (8-aligned)
            kb = k[lo:lo + NPATCH].astype(jnp.bfloat16)
            vb = v[lo:lo + NPATCH].astype(jnp.bfloat16)
            ktv = jax.lax.dot_general(kb, vb, (((0,), (0,)), ((), ())),
                                      preferred_element_type=jnp.float32)   # [E, E]
            ktv = (ktv * mask).astype(jnp.bfloat16)                  # per-head diag blocks
            qb = q[lo:lo + NPATCH].astype(jnp.bfloat16)
            attn_parts.append(jnp.dot(qb, ktv, preferred_element_type=jnp.float32))
        attn = jnp.concatenate(attn_parts, axis=0)                   # [B*T, E] in '(n h)' order
        x = x + _mm(attn, wp)                                        # residual_dropout = identity

        # ---- MLP: Linear -> GELU -> Linear ----
        h2 = _layernorm(x, vecs_ref[rb + 2:rb + 3, :EMBED], vecs_ref[rb + 3:rb + 4, :EMBED])
        w1 = ww_ref[l * EMBED:(l + 1) * EMBED, :HM]                  # [E, HM]
        m = _mm(h2, w1) + vecs_ref[rb + 4:rb + 5, :HM]
        m = _gelu(m)
        x = x + _mm(m, w2) + vecs_ref[rb + 5:rb + 6, :EMBED]         # mlp_dropout = identity

    # ---- per-image mean pool over tokens, then classification head (lane-dense 128) ----
    pooled = jnp.concatenate(
        [jnp.mean(x[bi * NPATCH:(bi + 1) * NPATCH], axis=0, keepdims=True)
         for bi in range(BATCH)], axis=0)                            # [B, E]
    w_head = ww_ref[W_HEAD_ROW:W_HEAD_ROW + EMBED, :]                # [E, 128] (zero-padded)
    logits = _mm(pooled, w_head) + vecs_ref[R_BHEAD:R_BHEAD + 1, :]  # [B, 128]
    out_ref[...] = logits


# ----------------------- wrapper -----------------------
def _patchify(x_nchw):
    B = x_nchw.shape[0]
    x = x_nchw.reshape(B, CHANNELS, IMG // PATCH, PATCH, IMG // PATCH, PATCH)
    # 'b c (h p1) (w p2) -> b (h w) (p1 p2 c)'
    x = x.transpose(0, 2, 4, 3, 5, 1).reshape(B, NPATCH, PD)
    return x


@jax.jit
def vit_forward(x_nchw, params):
    B = x_nchw.shape[0]
    patches = _patchify(x_nchw).astype(jnp.float32).reshape(B * NPATCH, PD)
    out = pl.pallas_call(
        vit_kernel,
        out_shape=jax.ShapeDtypeStruct((B, VECW), jnp.float32),      # lane-dense [B, 128]
    )(patches, params["vecs"], params["wa"], params["ww"])
    return out[:, :NUM_CLASSES]


# ----------------------- parameter construction -----------------------
def init_raw_params(key):
    """PyTorch-layout parameters (deterministic, synthetic)."""
    ks = iter(jax.random.split(key, 40))

    def rnd(shape, scale=0.02):
        return (scale * jax.random.normal(next(ks), shape)).astype(jnp.float32)

    raw = {
        "lnp_w": jnp.ones((PD,), jnp.float32) + rnd((PD,)),
        "lnp_b": rnd((PD,)),
        "W_pe": rnd((EMBED, PD), 0.05),                  # Linear(P, E).weight  [out, in]
        "lne_w": jnp.ones((EMBED,), jnp.float32) + rnd((EMBED,)),
        "lne_b": rnd((EMBED,)),
        "pos": jax.random.normal(next(ks), (NPATCH, EMBED), jnp.float32),
        "ln1_w": jnp.ones((DEPTH, EMBED), jnp.float32) + rnd((DEPTH, EMBED)),
        "ln1_b": rnd((DEPTH, EMBED)),
        "W_qkv": rnd((DEPTH, 3 * EMBED, EMBED), 0.05),   # [out, in]
        "W_proj": rnd((DEPTH, EMBED, EMBED), 0.05),
        "ln2_w": jnp.ones((DEPTH, EMBED), jnp.float32) + rnd((DEPTH, EMBED)),
        "ln2_b": rnd((DEPTH, EMBED)),
        "W1": rnd((DEPTH, HM, EMBED), 0.05),
        "b1": rnd((DEPTH, HM)),
        "W2": rnd((DEPTH, EMBED, HM), 0.05),
        "b2": rnd((DEPTH, EMBED)),
        "W_head": rnd((NUM_CLASSES, EMBED), 0.05),
        "b_head": rnd((NUM_CLASSES,)),
    }
    return raw


def to_kernel_params(raw):
    """PyTorch-layout weights -> 3 packed kernel slabs (1 f32 + 2 bf16)."""
    bf16 = jnp.bfloat16

    def padrow(v):
        return jnp.pad(v, (0, VECW - v.shape[0]))

    # --- f32 constant slab: LN scales/biases, MLP biases, b_head, pos, head mask ---
    rows = [padrow(raw["lnp_w"]), padrow(raw["lnp_b"]),
            padrow(raw["lne_w"]), padrow(raw["lne_b"])]
    for l in range(DEPTH):
        rows += [padrow(raw["ln1_w"][l]), padrow(raw["ln1_b"][l]),
                 padrow(raw["ln2_w"][l]), padrow(raw["ln2_b"][l]),
                 padrow(raw["b1"][l]), padrow(raw["b2"][l])]
    rows.append(padrow(raw["b_head"]))                               # row R_BHEAD
    while len(rows) < R_POS:
        rows.append(jnp.zeros((VECW,), jnp.float32))
    head = jnp.stack(rows)                                           # [R_POS, 128]
    pos_pad = jnp.pad(raw["pos"], ((0, 0), (0, VECW - EMBED)))       # [T, 128]
    hid = jnp.arange(EMBED) // HS
    mask = (hid[:, None] == hid[None, :]).astype(jnp.float32)        # [E, E] block-diag
    mask_pad = jnp.pad(mask, ((0, 0), (0, VECW - EMBED)))            # [E, 128]
    vecs = jnp.concatenate([head, pos_pad, mask_pad], axis=0)        # [VEC_ROWS, 128]
    assert vecs.shape == (VEC_ROWS, VECW)

    # head-contiguous column reorder: new col n*HS + h  <-  old out-feature h*HEADS + n
    # (reference rearrange 'b t (h n) -> b n t h' has the head index n as the FAST axis)
    def head_contig(Wio):                                            # [E_in, E_out]
        return Wio.reshape(EMBED, HS, HEADS).transpose(0, 2, 1).reshape(EMBED, EMBED)

    # --- bf16 narrow slab (32 lanes): w_pe + per-layer wq,wk,wv,wproj,w2 ---
    blocks = [raw["W_pe"].T]                                         # [PD, E]
    for l in range(DEPTH):
        Wio = raw["W_qkv"][l].T                                      # [E, 3E] input-major
        Wq, Wk, Wv = Wio[:, :EMBED], Wio[:, EMBED:2 * EMBED], Wio[:, 2 * EMBED:]
        blocks += [head_contig(Wq) * SCALE, head_contig(Wk), head_contig(Wv),
                   raw["W_proj"][l].T,                               # proj input already '(n h)'
                   raw["W2"][l].T]                                   # [HM, E]
    wa = jnp.concatenate(blocks, axis=0).astype(bf16)                # [A_ROWS, E]
    assert wa.shape == (A_ROWS, EMBED)

    # --- bf16 wide slab (128 lanes): per-layer W1 (padded) + W_head (padded) ---
    wide = [jnp.pad(raw["W1"][l].T, ((0, 0), (0, VECW - HM))) for l in range(DEPTH)]
    w_head = jnp.pad(raw["W_head"].T, ((0, 0), (0, VECW - NUM_CLASSES)))
    ww = jnp.concatenate(wide + [w_head], axis=0).astype(bf16)       # [W_ROWS, 128]
    assert ww.shape == (W_ROWS, VECW)

    return {"vecs": vecs, "wa": wa, "ww": ww}


# ----------------------- pure-JAX reference (PyTorch semantics) -----------------------
def reference_forward(x_nchw, raw):
    B = x_nchw.shape[0]
    x = _patchify(x_nchw).astype(jnp.float32)

    def ln(t, w, b):
        mu = t.mean(-1, keepdims=True)
        var = ((t - mu) ** 2).mean(-1, keepdims=True)
        return (t - mu) / jnp.sqrt(var + EPS) * w + b

    x = ln(x, raw["lnp_w"], raw["lnp_b"])
    x = x @ raw["W_pe"].T
    x = ln(x, raw["lne_w"], raw["lne_b"])
    x = x + raw["pos"][None]

    for l in range(DEPTH):
        h = ln(x, raw["ln1_w"][l], raw["ln1_b"][l])
        qkv = h @ raw["W_qkv"][l].T
        q, k, v = jnp.split(qkv, 3, axis=-1)

        def heads(t):  # 'b t (h n) -> b n t h'
            return t.reshape(B, NPATCH, HS, HEADS).transpose(0, 3, 1, 2)

        q, k, v = heads(q), heads(k), heads(v)
        s = jnp.einsum("bnth,bnsh->bnts", q, k) * SCALE              # no softmax (as in reference)
        a = jnp.einsum("bnts,bnsh->bnth", s, v)
        a = a.transpose(0, 2, 1, 3).reshape(B, NPATCH, EMBED)        # 'b n t h -> b t (n h)'
        x = x + a @ raw["W_proj"][l].T

        h2 = ln(x, raw["ln2_w"][l], raw["ln2_b"][l])
        m = jax.nn.gelu(h2 @ raw["W1"][l].T + raw["b1"][l], approximate=False)
        x = x + m @ raw["W2"][l].T + raw["b2"][l]

    x = x.mean(axis=1)
    return x @ raw["W_head"].T + raw["b_head"]


# ----------------------- main -----------------------
if __name__ == "__main__":
    key = jax.random.PRNGKey(0)
    k_x, k_p = jax.random.split(key)
    x = jax.random.normal(k_x, (BATCH, CHANNELS, IMG, IMG), jnp.float32)

    raw = init_raw_params(k_p)
    params = to_kernel_params(raw)

    out = vit_forward(x, params)
    out = jax.block_until_ready(out)

    ref = reference_forward(x, raw)
    assert out.shape == (BATCH, NUM_CLASSES), out.shape
    assert jnp.allclose(out, ref, rtol=1e-2, atol=1e-2), (
        f"max abs diff {jnp.max(jnp.abs(out - ref))}")

    print("KERNEL_OK")
</pallas_src>

<mosaic_0001>
module attributes {stable_mosaic.version = 11 : i64} {
  func.func @vit_kernel(%arg0: memref<32x64xf32, #tpu.memory_space<vmem>>, %arg1: memref<72x128xf32, #tpu.memory_space<vmem>>, %arg2: memref<448x32xbf16, #tpu.memory_space<vmem>>, %arg3: memref<96x128xbf16, #tpu.memory_space<vmem>>, %arg4: memref<2x128xf32, #tpu.memory_space<vmem>>) attributes {dimension_semantics = [], scalar_prefetch = 0 : i64, scratch_operands = 0 : i64, tpu.core_type = #tpu.core_type<tc>} {
    %c0 = arith.constant 0 : index
    %c0_0 = arith.constant 0 : index
    %0 = vector.load %arg0[%c0, %c0_0] : memref<32x64xf32, #tpu.memory_space<vmem>>, vector<32x64xf32>
    %c0_1 = arith.constant 0 : index
    %c0_2 = arith.constant 0 : index
    %1 = vector.load %arg1[%c0_1, %c0_2] : memref<72x128xf32, #tpu.memory_space<vmem>>, vector<1x64xf32>
    %c1 = arith.constant 1 : index
    %c0_3 = arith.constant 0 : index
    %2 = vector.load %arg1[%c1, %c0_3] : memref<72x128xf32, #tpu.memory_space<vmem>>, vector<1x64xf32>
    %cst = arith.constant dense<0.000000e+00> : vector<32xf32>
    %3 = vector.multi_reduction <add>, %0, %cst [1] : vector<32x64xf32> to vector<32xf32>
    %4 = vector.shape_cast %3 : vector<32xf32> to vector<32x1xf32>
    %cst_4 = arith.constant 6.400000e+01 : f32
    %5 = vector.broadcast %cst_4 : f32 to vector<32x1xf32>
    %6 = arith.divf %4, %5 : vector<32x1xf32>
    %7 = arith.mulf %0, %0 : vector<32x64xf32>
    %cst_5 = arith.constant dense<0.000000e+00> : vector<32xf32>
    %8 = vector.multi_reduction <add>, %7, %cst_5 [1] : vector<32x64xf32> to vector<32xf32>
    %9 = vector.shape_cast %8 : vector<32xf32> to vector<32x1xf32>
    %cst_6 = arith.constant 6.400000e+01 : f32
    %10 = vector.broadcast %cst_6 : f32 to vector<32x1xf32>
    %11 = arith.divf %9, %10 : vector<32x1xf32>
    %12 = arith.mulf %6, %6 : vector<32x1xf32>
    %13 = arith.subf %11, %12 : vector<32x1xf32>
    %cst_7 = arith.constant 9.99999974E-6 : f32
    %14 = vector.broadcast %cst_7 : f32 to vector<32x1xf32>
    %15 = arith.addf %13, %14 : vector<32x1xf32>
    %16 = math.rsqrt %15 : vector<32x1xf32>
    %17 = vector.broadcast %6 : vector<32x1xf32> to vector<32x64xf32>
    %18 = arith.subf %0, %17 : vector<32x64xf32>
    %19 = vector.broadcast %16 : vector<32x1xf32> to vector<32x64xf32>
    %20 = arith.mulf %18, %19 : vector<32x64xf32>
    %21 = vector.broadcast %1 : vector<1x64xf32> to vector<32x64xf32>
    %22 = arith.mulf %20, %21 : vector<32x64xf32>
    %23 = vector.broadcast %2 : vector<1x64xf32> to vector<32x64xf32>
    %24 = arith.addf %22, %23 : vector<32x64xf32>
    %c0_8 = arith.constant 0 : index
    %c0_9 = arith.constant 0 : index
    %25 = vector.load %arg2[%c0_8, %c0_9] : memref<448x32xbf16, #tpu.memory_space<vmem>>, vector<64x32xbf16>
    %26 = arith.truncf %24 : vector<32x64xf32> to vector<32x64xbf16>
    %cst_10 = arith.constant dense<0.000000e+00> : vector<32x32xf32>
    %27 = tpu.matmul %26, %25, %cst_10 {dimension_numbers = #tpu.dot_dimension_numbers<[1], [0], [0], [1], [0, 0, 1, 1], [], []>} : vector<32x64xbf16>, vector<64x32xbf16>, vector<32x32xf32> -> vector<32x32xf32>
    %c2 = arith.constant 2 : index
    %c0_11 = arith.constant 0 : index
    %28 = vector.load %arg1[%c2, %c0_11] : memref<72x128xf32, #tpu.memory_space<vmem>>, vector<1x32xf32>
    %c3 = arith.constant 3 : index
    %c0_12 = arith.constant 0 : index
    %29 = vector.load %arg1[%c3, %c0_12] : memref<72x128xf32, #tpu.memory_space<vmem>>, vector<1x32xf32>
    %cst_13 = arith.constant dense<0.000000e+00> : vector<32xf32>
    %30 = vector.multi_reduction <add>, %27, %cst_13 [1] : vector<32x32xf32> to vector<32xf32>
    %31 = vector.shape_cast %30 : vector<32xf32> to vector<32x1xf32>
    %cst_14 = arith.constant 3.200000e+01 : f32
    %32 = vector.broadcast %cst_14 : f32 to vector<32x1xf32>
    %33 = arith.divf %31, %32 : vector<32x1xf32>
    %34 = arith.mulf %27, %27 : vector<32x32xf32>
    %cst_15 = arith.constant dense<0.000000e+00> : vector<32xf32>
    %35 = vector.multi_reduction <add>, %34, %cst_15 [1] : vector<32x32xf32> to vector<32xf32>
    %36 = vector.shape_cast %35 : vector<32xf32> to vector<32x1xf32>
    %cst_16 = arith.constant 3.200000e+01 : f32
    %37 = vector.broadcast %cst_16 : f32 to vector<32x1xf32>
    %38 = arith.divf %36, %37 : vector<32x1xf32>
    %39 = arith.mulf %33, %33 : vector<32x1xf32>
    %40 = arith.subf %38, %39 : vector<32x1xf32>
    %cst_17 = arith.constant 9.99999974E-6 : f32
    %41 = vector.broadcast %cst_17 : f32 to vector<32x1xf32>
    %42 = arith.addf %40, %41 : vector<32x1xf32>
    %43 = math.rsqrt %42 : vector<32x1xf32>
    %44 = vector.broadcast %33 : vector<32x1xf32> to vector<32x32xf32>
    %45 = arith.subf %27, %44 : vector<32x32xf32>
    %46 = vector.broadcast %43 : vector<32x1xf32> to vector<32x32xf32>
    %47 = arith.mulf %45, %46 : vector<32x32xf32>
    %48 = vector.broadcast %28 : vector<1x32xf32> to vector<32x32xf32>
    %49 = arith.mulf %47, %48 : vector<32x32xf32>
    %50 = vector.broadcast %29 : vector<1x32xf32> to vector<32x32xf32>
    %51 = arith.addf %49, %50 : vector<32x32xf32>
    %c24 = arith.constant 24 : index
    %c0_18 = arith.constant 0 : index
    %52 = vector.load %arg1[%c24, %c0_18] : memref<72x128xf32, #tpu.memory_space<vmem>>, vector<16x32xf32>
    %53 = tpu.concatenate %52, %52 in 0 : vector<16x32xf32>, vector<16x32xf32> -> vector<32x32xf32>
    %54 = arith.addf %51, %53 : vector<32x32xf32>
    %c40 = arith.constant 40 : index
    %c0_19 = arith.constant 0 : index
    %55 = vector.load %arg1[%c40, %c0_19] : memref<72x128xf32, #tpu.memory_space<vmem>>, vector<32x32xf32>
    %c4 = arith.constant 4 : index
    %c0_20 = arith.constant 0 : index
    %56 = vector.load %arg1[%c4, %c0_20] : memref<72x128xf32, #tpu.memory_space<vmem>>, vector<1x32xf32>
    %c5 = arith.constant 5 : index
    %c0_21 = arith.constant 0 : index
    %57 = vector.load %arg1[%c5, %c0_21] : memref<72x128xf32, #tpu.memory_space<vmem>>, vector<1x32xf32>
    %cst_22 = arith.constant dense<0.000000e+00> : vector<32xf32>
    %58 = vector.multi_reduction <add>, %54, %cst_22 [1] : vector<32x32xf32> to vector<32xf32>
    %59 = vector.shape_cast %58 : vector<32xf32> to vector<32x1xf32>
    %cst_23 = arith.constant 3.200000e+01 : f32
    %60 = vector.broadcast %cst_23 : f32 to vector<32x1xf32>
    %61 = arith.divf %59, %60 : vector<32x1xf32>
    %62 = arith.mulf %54, %54 : vector<32x32xf32>
    %cst_24 = arith.constant dense<0.000000e+00> : vector<32xf32>
    %63 = vector.multi_reduction <add>, %62, %cst_24 [1] : vector<32x32xf32> to vector<32xf32>
    %64 = vector.shape_cast %63 : vector<32xf32> to vector<32x1xf32>
    %cst_25 = arith.constant 3.200000e+01 : f32
    %65 = vector.broadcast %cst_25 : f32 to vector<32x1xf32>
    %66 = arith.divf %64, %65 : vector<32x1xf32>
    %67 = arith.mulf %61, %61 : vector<32x1xf32>
    %68 = arith.subf %66, %67 : vector<32x1xf32>
    %cst_26 = arith.constant 9.99999974E-6 : f32
    %69 = vector.broadcast %cst_26 : f32 to vector<32x1xf32>
    %70 = arith.addf %68, %69 : vector<32x1xf32>
    %71 = math.rsqrt %70 : vector<32x1xf32>
    %72 = vector.broadcast %61 : vector<32x1xf32> to vector<32x32xf32>
    %73 = arith.subf %54, %72 : vector<32x32xf32>
    %74 = vector.broadcast %71 : vector<32x1xf32> to vector<32x32xf32>
    %75 = arith.mulf %73, %74 : vector<32x32xf32>
    %76 = vector.broadcast %56 : vector<1x32xf32> to vector<32x32xf32>
    %77 = arith.mulf %75, %76 : vector<32x32xf32>
    %78 = vector.broadcast %57 : vector<1x32xf32> to vector<32x32xf32>
    %79 = arith.addf %77, %78 : vector<32x32xf32>
    %80 = arith.truncf %79 : vector<32x32xf32> to vector<32x32xbf16>
    %c64 = arith.constant 64 : index
    %c0_27 = arith.constant 0 : index
    %81 = vector.load %arg2[%c64, %c0_27] : memref<448x32xbf16, #tpu.memory_space<vmem>>, vector<32x32xbf16>
    %c96 = arith.constant 96 : index
    %c0_28 = arith.constant 0 : index
    %82 = vector.load %arg2[%c96, %c0_28] : memref<448x32xbf16, #tpu.memory_space<vmem>>, vector<32x32xbf16>
    %c128 = arith.constant 128 : index
    %c0_29 = arith.constant 0 : index
    %83 = vector.load %arg2[%c128, %c0_29] : memref<448x32xbf16, #tpu.memory_space<vmem>>, vector<32x32xbf16>
    %c160 = arith.constant 160 : index
    %c0_30 = arith.constant 0 : index
    %84 = vector.load %arg2[%c160, %c0_30] : memref<448x32xbf16, #tpu.memory_space<vmem>>, vector<32x32xbf16>
    %c192 = arith.constant 192 : index
    %c0_31 = arith.constant 0 : index
    %85 = vector.load %arg2[%c192, %c0_31] : memref<448x32xbf16, #tpu.memory_space<vmem>>, vector<64x32xbf16>
    %cst_32 = arith.constant dense<0.000000e+00> : vector<32x32xf32>
    %86 = tpu.matmul %80, %81, %cst_32 {dimension_numbers = #tpu.dot_dimension_numbers<[1], [0], [0], [1], [0, 0, 1, 1], [], []>} : vector<32x32xbf16>, vector<32x32xbf16>, vector<32x32xf32> -> vector<32x32xf32>
    %cst_33 = arith.constant dense<0.000000e+00> : vector<32x32xf32>
    %87 = tpu.matmul %80, %82, %cst_33 {dimension_numbers = #tpu.dot_dimension_numbers<[1], [0], [0], [1], [0, 0, 1, 1], [], []>} : vector<32x32xbf16>, vector<32x32xbf16>, vector<32x32xf32> -> vector<32x32xf32>
    %cst_34 = arith.constant dense<0.000000e+00> : vector<32x32xf32>
    %88 = tpu.matmul %80, %83, %cst_34 {dimension_numbers = #tpu.dot_dimension_numbers<[1], [0], [0], [1], [0, 0, 1, 1], [], []>} : vector<32x32xbf16>, vector<32x32xbf16>, vector<32x32xf32> -> vector<32x32xf32>
    %89 = vector.extract_strided_slice %87 {offsets = [0, 0], sizes = [16, 32], strides = [1, 1]} : vector<32x32xf32> to vector<16x32xf32>
    %90 = arith.truncf %89 : vector<16x32xf32> to vector<16x32xbf16>
    %91 = vector.extract_strided_slice %88 {offsets = [0, 0], sizes = [16, 32], strides = [1, 1]} : vector<32x32xf32> to vector<16x32xf32>
    %92 = arith.truncf %91 : vector<16x32xf32> to vector<16x32xbf16>
    %cst_35 = arith.constant dense<0.000000e+00> : vector<32x32xf32>
    %93 = tpu.matmul %90, %92, %cst_35 {dimension_numbers = #tpu.dot_dimension_numbers<[0], [0], [1], [1], [0, 1, 1, 1], [], []>} : vector<16x32xbf16>, vector<16x32xbf16>, vector<32x32xf32> -> vector<32x32xf32>
    %94 = arith.mulf %93, %55 : vector<32x32xf32>
    %95 = arith.truncf %94 : vector<32x32xf32> to vector<32x32xbf16>
    %96 = vector.extract_strided_slice %86 {offsets = [0, 0], sizes = [16, 32], strides = [1, 1]} : vector<32x32xf32> to vector<16x32xf32>
    %97 = arith.truncf %96 : vector<16x32xf32> to vector<16x32xbf16>
    %cst_36 = arith.constant dense<0.000000e+00> : vector<16x32xf32>
    %98 = tpu.matmul %97, %95, %cst_36 {dimension_numbers = #tpu.dot_dimension_numbers<[1], [0], [0], [1], [0, 0, 1, 1], [], []>} : vector<16x32xbf16>, vector<32x32xbf16>, vector<16x32xf32> -> vector<16x32xf32>
    %99 = vector.extract_strided_slice %87 {offsets = [16, 0], sizes = [16, 32], strides = [1, 1]} : vector<32x32xf32> to vector<16x32xf32>
    %100 = arith.truncf %99 : vector<16x32xf32> to vector<16x32xbf16>
    %101 = vector.extract_strided_slice %88 {offsets = [16, 0], sizes = [16, 32], strides = [1, 1]} : vector<32x32xf32> to vector<16x32xf32>
    %102 = arith.truncf %101 : vector<16x32xf32> to vector<16x32xbf16>
    %cst_37 = arith.constant dense<0.000000e+00> : vector<32x32xf32>
    %103 = tpu.matmul %100, %102, %cst_37 {dimension_numbers = #tpu.dot_dimension_numbers<[0], [0], [1], [1], [0, 1, 1, 1], [], []>} : vector<16x32xbf16>, vector<16x32xbf16>, vector<32x32xf32> -> vector<32x32xf32>
    %104 = arith.mulf %103, %55 : vector<32x32xf32>
    %105 = arith.truncf %104 : vector<32x32xf32> to vector<32x32xbf16>
    %106 = vector.extract_strided_slice %86 {offsets = [16, 0], sizes = [16, 32], strides = [1, 1]} : vector<32x32xf32> to vector<16x32xf32>
    %107 = arith.truncf %106 : vector<16x32xf32> to vector<16x32xbf16>
    %cst_38 = arith.constant dense<0.000000e+00> : vector<16x32xf32>
    %108 = tpu.matmul %107, %105, %cst_38 {dimension_numbers = #tpu.dot_dimension_numbers<[1], [0], [0], [1], [0, 0, 1, 1], [], []>} : vector<16x32xbf16>, vector<32x32xbf16>, vector<16x32xf32> -> vector<16x32xf32>
    %109 = tpu.concatenate %98, %108 in 0 : vector<16x32xf32>, vector<16x32xf32> -> vector<32x32xf32>
    %110 = arith.truncf %109 : vector<32x32xf32> to vector<32x32xbf16>
    %cst_39 = arith.constant dense<0.000000e+00> : vector<32x32xf32>
    %111 = tpu.matmul %110, %84, %cst_39 {dimension_numbers = #tpu.dot_dimension_numbers<[1], [0], [0], [1], [0, 0, 1, 1], [], []>} : vector<32x32xbf16>, vector<32x32xbf16>, vector<32x32xf32> -> vector<32x32xf32>
    %112 = arith.addf %54, %111 : vector<32x32xf32>
    %c6 = arith.constant 6 : index
    %c0_40 = arith.constant 0 : index
    %113 = vector.load %arg1[%c6, %c0_40] : memref<72x128xf32, #tpu.memory_space<vmem>>, vector<1x32xf32>
    %c7 = arith.constant 7 : index
    %c0_41 = arith.constant 0 : index
    %114 = vector.load %arg1[%c7, %c0_41] : memref<72x128xf32, #tpu.memory_space<vmem>>, vector<1x32xf32>
    %cst_42 = arith.constant dense<0.000000e+00> : vector<32xf32>
    %115 = vector.multi_reduction <add>, %112, %cst_42 [1] : vector<32x32xf32> to vector<32xf32>
    %116 = vector.shape_cast %115 : vector<32xf32> to vector<32x1xf32>
    %cst_43 = arith.constant 3.200000e+01 : f32
    %117 = vector.broadcast %cst_43 : f32 to vector<32x1xf32>
    %118 = arith.divf %116, %117 : vector<32x1xf32>
    %119 = arith.mulf %112, %112 : vector<32x32xf32>
    %cst_44 = arith.constant dense<0.000000e+00> : vector<32xf32>
    %120 = vector.multi_reduction <add>, %119, %cst_44 [1] : vector<32x32xf32> to vector<32xf32>
    %121 = vector.shape_cast %120 : vector<32xf32> to vector<32x1xf32>
    %cst_45 = arith.constant 3.200000e+01 : f32
    %122 = vector.broadcast %cst_45 : f32 to vector<32x1xf32>
    %123 = arith.divf %121, %122 : vector<32x1xf32>
    %124 = arith.mulf %118, %118 : vector<32x1xf32>
    %125 = arith.subf %123, %124 : vector<32x1xf32>
    %cst_46 = arith.constant 9.99999974E-6 : f32
    %126 = vector.broadcast %cst_46 : f32 to vector<32x1xf32>
    %127 = arith.addf %125, %126 : vector<32x1xf32>
    %128 = math.rsqrt %127 : vector<32x1xf32>
    %129 = vector.broadcast %118 : vector<32x1xf32> to vector<32x32xf32>
    %130 = arith.subf %112, %129 : vector<32x32xf32>
    %131 = vector.broadcast %128 : vector<32x1xf32> to vector<32x32xf32>
    %132 = arith.mulf %130, %131 : vector<32x32xf32>
    %133 = vector.broadcast %113 : vector<1x32xf32> to vector<32x32xf32>
    %134 = arith.mulf %132, %133 : vector<32x32xf32>
    %135 = vector.broadcast %114 : vector<1x32xf32> to vector<32x32xf32>
    %136 = arith.addf %134, %135 : vector<32x32xf32>
    %c0_47 = arith.constant 0 : index
    %c0_48 = arith.constant 0 : index
    %137 = vector.load %arg3[%c0_47, %c0_48] : memref<96x128xbf16, #tpu.memory_space<vmem>>, vector<32x64xbf16>
    %138 = arith.truncf %136 : vector<32x32xf32> to vector<32x32xbf16>
    %cst_49 = arith.constant dense<0.000000e+00> : vector<32x64xf32>
    %139 = tpu.matmul %138, %137, %cst_49 {dimension_numbers = #tpu.dot_dimension_numbers<[1], [0], [0], [1], [0, 0, 1, 1], [], []>} : vector<32x32xbf16>, vector<32x64xbf16>, vector<32x64xf32> -> vector<32x64xf32>
    %c8 = arith.constant 8 : index
    %c0_50 = arith.constant 0 : index
    %140 = vector.load %arg1[%c8, %c0_50] : memref<72x128xf32, #tpu.memory_space<vmem>>, vector<1x64xf32>
    %141 = vector.broadcast %140 : vector<1x64xf32> to vector<32x64xf32>
    %142 = arith.addf %139, %141 : vector<32x64xf32>
    %cst_51 = arith.constant 5.000000e-01 : f32
    %143 = vector.broadcast %cst_51 : f32 to vector<32x64xf32>
    %144 = arith.mulf %143, %142 : vector<32x64xf32>
    %cst_52 = arith.constant 4.471500e-02 : f32
    %145 = vector.broadcast %cst_52 : f32 to vector<32x64xf32>
    %146 = arith.mulf %145, %142 : vector<32x64xf32>
    %147 = arith.mulf %146, %142 : vector<32x64xf32>
    %148 = arith.mulf %147, %142 : vector<32x64xf32>
    %149 = arith.addf %142, %148 : vector<32x64xf32>
    %cst_53 = arith.constant 0.797884583 : f32
    %150 = vector.broadcast %cst_53 : f32 to vector<32x64xf32>
    %151 = arith.mulf %150, %149 : vector<32x64xf32>
    %152 = math.tanh %151 : vector<32x64xf32>
    %cst_54 = arith.constant 1.000000e+00 : f32
    %153 = vector.broadcast %cst_54 : f32 to vector<32x64xf32>
    %154 = arith.addf %153, %152 : vector<32x64xf32>
    %155 = arith.mulf %144, %154 : vector<32x64xf32>
    %156 = arith.truncf %155 : vector<32x64xf32> to vector<32x64xbf16>
    %cst_55 = arith.constant dense<0.000000e+00> : vector<32x32xf32>
    %157 = tpu.matmul %156, %85, %cst_55 {dimension_numbers = #tpu.dot_dimension_numbers<[1], [0], [0], [1], [0, 0, 1, 1], [], []>} : vector<32x64xbf16>, vector<64x32xbf16>, vector<32x32xf32> -> vector<32x32xf32>
    %158 = arith.addf %112, %157 : vector<32x32xf32>
    %c9 = arith.constant 9 : index
    %c0_56 = arith.constant 0 : index
    %159 = vector.load %arg1[%c9, %c0_56] : memref<72x128xf32, #tpu.memory_space<vmem>>, vector<1x32xf32>
    %160 = vector.broadcast %159 : vector<1x32xf32> to vector<32x32xf32>
    %161 = arith.addf %158, %160 : vector<32x32xf32>
    %c10 = arith.constant 10 : index
    %c0_57 = arith.constant 0 : index
    %162 = vector.load %arg1[%c10, %c0_57] : memref<72x128xf32, #tpu.memory_space<vmem>>, vector<1x32xf32>
    %c11 = arith.constant 11 : index
    %c0_58 = arith.constant 0 : index
    %163 = vector.load %arg1[%c11, %c0_58] : memref<72x128xf32, #tpu.memory_space<vmem>>, vector<1x32xf32>
    %cst_59 = arith.constant dense<0.000000e+00> : vector<32xf32>
    %164 = vector.multi_reduction <add>, %161, %cst_59 [1] : vector<32x32xf32> to vector<32xf32>
    %165 = vector.shape_cast %164 : vector<32xf32> to vector<32x1xf32>
    %cst_60 = arith.constant 3.200000e+01 : f32
    %166 = vector.broadcast %cst_60 : f32 to vector<32x1xf32>
    %167 = arith.divf %165, %166 : vector<32x1xf32>
    %168 = arith.mulf %161, %161 : vector<32x32xf32>
    %cst_61 = arith.constant dense<0.000000e+00> : vector<32xf32>
    %169 = vector.multi_reduction <add>, %168, %cst_61 [1] : vector<32x32xf32> to vector<32xf32>
    %170 = vector.shape_cast %169 : vector<32xf32> to vector<32x1xf32>
    %cst_62 = arith.constant 3.200000e+01 : f32
    %171 = vector.broadcast %cst_62 : f32 to vector<32x1xf32>
    %172 = arith.divf %170, %171 : vector<32x1xf32>
    %173 = arith.mulf %167, %167 : vector<32x1xf32>
    %174 = arith.subf %172, %173 : vector<32x1xf32>
    %cst_63 = arith.constant 9.99999974E-6 : f32
    %175 = vector.broadcast %cst_63 : f32 to vector<32x1xf32>
    %176 = arith.addf %174, %175 : vector<32x1xf32>
    %177 = math.rsqrt %176 : vector<32x1xf32>
    %178 = vector.broadcast %167 : vector<32x1xf32> to vector<32x32xf32>
    %179 = arith.subf %161, %178 : vector<32x32xf32>
    %180 = vector.broadcast %177 : vector<32x1xf32> to vector<32x32xf32>
    %181 = arith.mulf %179, %180 : vector<32x32xf32>
    %182 = vector.broadcast %162 : vector<1x32xf32> to vector<32x32xf32>
    %183 = arith.mulf %181, %182 : vector<32x32xf32>
    %184 = vector.broadcast %163 : vector<1x32xf32> to vector<32x32xf32>
    %185 = arith.addf %183, %184 : vector<32x32xf32>
    %186 = arith.truncf %185 : vector<32x32xf32> to vector<32x32xbf16>
    %c256 = arith.constant 256 : index
    %c0_64 = arith.constant 0 : index
    %187 = vector.load %arg2[%c256, %c0_64] : memref<448x32xbf16, #tpu.memory_space<vmem>>, vector<32x32xbf16>
    %c288 = arith.constant 288 : index
    %c0_65 = arith.constant 0 : index
    %188 = vector.load %arg2[%c288, %c0_65] : memref<448x32xbf16, #tpu.memory_space<vmem>>, vector<32x32xbf16>
    %c320 = arith.constant 320 : index
    %c0_66 = arith.constant 0 : index
    %189 = vector.load %arg2[%c320, %c0_66] : memref<448x32xbf16, #tpu.memory_space<vmem>>, vector<32x32xbf16>
    %c352 = arith.constant 352 : index
    %c0_67 = arith.constant 0 : index
    %190 = vector.load %arg2[%c352, %c0_67] : memref<448x32xbf16, #tpu.memory_space<vmem>>, vector<32x32xbf16>
    %c384 = arith.constant 384 : index
    %c0_68 = arith.constant 0 : index
    %191 = vector.load %arg2[%c384, %c0_68] : memref<448x32xbf16, #tpu.memory_space<vmem>>, vector<64x32xbf16>
    %cst_69 = arith.constant dense<0.000000e+00> : vector<32x32xf32>
    %192 = tpu.matmul %186, %187, %cst_69 {dimension_numbers = #tpu.dot_dimension_numbers<[1], [0], [0], [1], [0, 0, 1, 1], [], []>} : vector<32x32xbf16>, vector<32x32xbf16>, vector<32x32xf32> -> vector<32x32xf32>
    %cst_70 = arith.constant dense<0.000000e+00> : vector<32x32xf32>
    %193 = tpu.matmul %186, %188, %cst_70 {dimension_numbers = #tpu.dot_dimension_numbers<[1], [0], [0], [1], [0, 0, 1, 1], [], []>} : vector<32x32xbf16>, vector<32x32xbf16>, vector<32x32xf32> -> vector<32x32xf32>
    %cst_71 = arith.constant dense<0.000000e+00> : vector<32x32xf32>
    %194 = tpu.matmul %186, %189, %cst_71 {dimension_numbers = #tpu.dot_dimension_numbers<[1], [0], [0], [1], [0, 0, 1, 1], [], []>} : vector<32x32xbf16>, vector<32x32xbf16>, vector<32x32xf32> -> vector<32x32xf32>
    %195 = vector.extract_strided_slice %193 {offsets = [0, 0], sizes = [16, 32], strides = [1, 1]} : vector<32x32xf32> to vector<16x32xf32>
    %196 = arith.truncf %195 : vector<16x32xf32> to vector<16x32xbf16>
    %197 = vector.extract_strided_slice %194 {offsets = [0, 0], sizes = [16, 32], strides = [1, 1]} : vector<32x32xf32> to vector<16x32xf32>
    %198 = arith.truncf %197 : vector<16x32xf32> to vector<16x32xbf16>
    %cst_72 = arith.constant dense<0.000000e+00> : vector<32x32xf32>
    %199 = tpu.matmul %196, %198, %cst_72 {dimension_numbers = #tpu.dot_dimension_numbers<[0], [0], [1], [1], [0, 1, 1, 1], [], []>} : vector<16x32xbf16>, vector<16x32xbf16>, vector<32x32xf32> -> vector<32x32xf32>
    %200 = arith.mulf %199, %55 : vector<32x32xf32>
    %201 = arith.truncf %200 : vector<32x32xf32> to vector<32x32xbf16>
    %202 = vector.extract_strided_slice %192 {offsets = [0, 0], sizes = [16, 32], strides = [1, 1]} : vector<32x32xf32> to vector<16x32xf32>
    %203 = arith.truncf %202 : vector<16x32xf32> to vector<16x32xbf16>
    %cst_73 = arith.constant dense<0.000000e+00> : vector<16x32xf32>
    %204 = tpu.matmul %203, %201, %cst_73 {dimension_numbers = #tpu.dot_dimension_numbers<[1], [0], [0], [1], [0, 0, 1, 1], [], []>} : vector<16x32xbf16>, vector<32x32xbf16>, vector<16x32xf32> -> vector<16x32xf32>
    %205 = vector.extract_strided_slice %193 {offsets = [16, 0], sizes = [16, 32], strides = [1, 1]} : vector<32x32xf32> to vector<16x32xf32>
    %206 = arith.truncf %205 : vector<16x32xf32> to vector<16x32xbf16>
    %207 = vector.extract_strided_slice %194 {offsets = [16, 0], sizes = [16, 32], strides = [1, 1]} : vector<32x32xf32> to vector<16x32xf32>
    %208 = arith.truncf %207 : vector<16x32xf32> to vector<16x32xbf16>
    %cst_74 = arith.constant dense<0.000000e+00> : vector<32x32xf32>
    %209 = tpu.matmul %206, %208, %cst_74 {dimension_numbers = #tpu.dot_dimension_numbers<[0], [0], [1], [1], [0, 1, 1, 1], [], []>} : vector<16x32xbf16>, vector<16x32xbf16>, vector<32x32xf32> -> vector<32x32xf32>
    %210 = arith.mulf %209, %55 : vector<32x32xf32>
    %211 = arith.truncf %210 : vector<32x32xf32> to vector<32x32xbf16>
    %212 = vector.extract_strided_slice %192 {offsets = [16, 0], sizes = [16, 32], strides = [1, 1]} : vector<32x32xf32> to vector<16x32xf32>
    %213 = arith.truncf %212 : vector<16x32xf32> to vector<16x32xbf16>
    %cst_75 = arith.constant dense<0.000000e+00> : vector<16x32xf32>
    %214 = tpu.matmul %213, %211, %cst_75 {dimension_numbers = #tpu.dot_dimension_numbers<[1], [0], [0], [1], [0, 0, 1, 1], [], []>} : vector<16x32xbf16>, vector<32x32xbf16>, vector<16x32xf32> -> vector<16x32xf32>
    %215 = tpu.concatenate %204, %214 in 0 : vector<16x32xf32>, vector<16x32xf32> -> vector<32x32xf32>
    %216 = arith.truncf %215 : vector<32x32xf32> to vector<32x32xbf16>
    %cst_76 = arith.constant dense<0.000000e+00> : vector<32x32xf32>
    %217 = tpu.matmul %216, %190, %cst_76 {dimension_numbers = #tpu.dot_dimension_numbers<[1], [0], [0], [1], [0, 0, 1, 1], [], []>} : vector<32x32xbf16>, vector<32x32xbf16>, vector<32x32xf32> -> vector<32x32xf32>
    %218 = arith.addf %161, %217 : vector<32x32xf32>
    %c12 = arith.constant 12 : index
    %c0_77 = arith.constant 0 : index
    %219 = vector.load %arg1[%c12, %c0_77] : memref<72x128xf32, #tpu.memory_space<vmem>>, vector<1x32xf32>
    %c13 = arith.constant 13 : index
    %c0_78 = arith.constant 0 : index
    %220 = vector.load %arg1[%c13, %c0_78] : memref<72x128xf32, #tpu.memory_space<vmem>>, vector<1x32xf32>
    %cst_79 = arith.constant dense<0.000000e+00> : vector<32xf32>
    %221 = vector.multi_reduction <add>, %218, %cst_79 [1] : vector<32x32xf32> to vector<32xf32>
    %222 = vector.shape_cast %221 : vector<32xf32> to vector<32x1xf32>
    %cst_80 = arith.constant 3.200000e+01 : f32
    %223 = vector.broadcast %cst_80 : f32 to vector<32x1xf32>
    %224 = arith.divf %222, %223 : vector<32x1xf32>
    %225 = arith.mulf %218, %218 : vector<32x32xf32>
    %cst_81 = arith.constant dense<0.000000e+00> : vector<32xf32>
    %226 = vector.multi_reduction <add>, %225, %cst_81 [1] : vector<32x32xf32> to vector<32xf32>
    %227 = vector.shape_cast %226 : vector<32xf32> to vector<32x1xf32>
    %cst_82 = arith.constant 3.200000e+01 : f32
    %228 = vector.broadcast %cst_82 : f32 to vector<32x1xf32>
    %229 = arith.divf %227, %228 : vector<32x1xf32>
    %230 = arith.mulf %224, %224 : vector<32x1xf32>
    %231 = arith.subf %229, %230 : vector<32x1xf32>
    %cst_83 = arith.constant 9.99999974E-6 : f32
    %232 = vector.broadcast %cst_83 : f32 to vector<32x1xf32>
    %233 = arith.addf %231, %232 : vector<32x1xf32>
    %234 = math.rsqrt %233 : vector<32x1xf32>
    %235 = vector.broadcast %224 : vector<32x1xf32> to vector<32x32xf32>
    %236 = arith.subf %218, %235 : vector<32x32xf32>
    %237 = vector.broadcast %234 : vector<32x1xf32> to vector<32x32xf32>
    %238 = arith.mulf %236, %237 : vector<32x32xf32>
    %239 = vector.broadcast %219 : vector<1x32xf32> to vector<32x32xf32>
    %240 = arith.mulf %238, %239 : vector<32x32xf32>
    %241 = vector.broadcast %220 : vector<1x32xf32> to vector<32x32xf32>
    %242 = arith.addf %240, %241 : vector<32x32xf32>
    %c32 = arith.constant 32 : index
    %c0_84 = arith.constant 0 : index
    %243 = vector.load %arg3[%c32, %c0_84] : memref<96x128xbf16, #tpu.memory_space<vmem>>, vector<32x64xbf16>
    %244 = arith.truncf %242 : vector<32x32xf32> to vector<32x32xbf16>
    %cst_85 = arith.constant dense<0.000000e+00> : vector<32x64xf32>
    %245 = tpu.matmul %244, %243, %cst_85 {dimension_numbers = #tpu.dot_dimension_numbers<[1], [0], [0], [1], [0, 0, 1, 1], [], []>} : vector<32x32xbf16>, vector<32x64xbf16>, vector<32x64xf32> -> vector<32x64xf32>
    %c14 = arith.constant 14 : index
    %c0_86 = arith.constant 0 : index
    %246 = vector.load %arg1[%c14, %c0_86] : memref<72x128xf32, #tpu.memory_space<vmem>>, vector<1x64xf32>
    %247 = vector.broadcast %246 : vector<1x64xf32> to vector<32x64xf32>
    %248 = arith.addf %245, %247 : vector<32x64xf32>
    %cst_87 = arith.constant 5.000000e-01 : f32
    %249 = vector.broadcast %cst_87 : f32 to vector<32x64xf32>
    %250 = arith.mulf %249, %248 : vector<32x64xf32>
    %cst_88 = arith.constant 4.471500e-02 : f32
    %251 = vector.broadcast %cst_88 : f32 to vector<32x64xf32>
    %252 = arith.mulf %251, %248 : vector<32x64xf32>
    %253 = arith.mulf %252, %248 : vector<32x64xf32>
    %254 = arith.mulf %253, %248 : vector<32x64xf32>
    %255 = arith.addf %248, %254 : vector<32x64xf32>
    %cst_89 = arith.constant 0.797884583 : f32
    %256 = vector.broadcast %cst_89 : f32 to vector<32x64xf32>
    %257 = arith.mulf %256, %255 : vector<32x64xf32>
    %258 = math.tanh %257 : vector<32x64xf32>
    %cst_90 = arith.constant 1.000000e+00 : f32
    %259 = vector.broadcast %cst_90 : f32 to vector<32x64xf32>
    %260 = arith.addf %259, %258 : vector<32x64xf32>
    %261 = arith.mulf %250, %260 : vector<32x64xf32>
    %262 = arith.truncf %261 : vector<32x64xf32> to vector<32x64xbf16>
    %cst_91 = arith.constant dense<0.000000e+00> : vector<32x32xf32>
    %263 = tpu.matmul %262, %191, %cst_91 {dimension_numbers = #tpu.dot_dimension_numbers<[1], [0], [0], [1], [0, 0, 1, 1], [], []>} : vector<32x64xbf16>, vector<64x32xbf16>, vector<32x32xf32> -> vector<32x32xf32>
    %264 = arith.addf %218, %263 : vector<32x32xf32>
    %c15 = arith.constant 15 : index
    %c0_92 = arith.constant 0 : index
    %265 = vector.load %arg1[%c15, %c0_92] : memref<72x128xf32, #tpu.memory_space<vmem>>, vector<1x32xf32>
    %266 = vector.broadcast %265 : vector<1x32xf32> to vector<32x32xf32>
    %267 = arith.addf %264, %266 : vector<32x32xf32>
    %268 = vector.extract_strided_slice %267 {offsets = [0, 0], sizes = [16, 32], strides = [1, 1]} : vector<32x32xf32> to vector<16x32xf32>
    %cst_93 = arith.constant dense<0.000000e+00> : vector<32xf32>
    %269 = vector.multi_reduction <add>, %268, %cst_93 [0] : vector<16x32xf32> to vector<32xf32>
    %270 = vector.shape_cast %269 : vector<32xf32> to vector<1x32xf32>
    %cst_94 = arith.constant 1.600000e+01 : f32
    %271 = vector.broadcast %cst_94 : f32 to vector<1x32xf32>
    %272 = arith.divf %270, %271 : vector<1x32xf32>
    %273 = vector.extract_strided_slice %267 {offsets = [16, 0], sizes = [16, 32], strides = [1, 1]} : vector<32x32xf32> to vector<16x32xf32>
    %cst_95 = arith.constant dense<0.000000e+00> : vector<32xf32>
    %274 = vector.multi_reduction <add>, %273, %cst_95 [0] : vector<16x32xf32> to vector<32xf32>
    %275 = vector.shape_cast %274 : vector<32xf32> to vector<1x32xf32>
    %cst_96 = arith.constant 1.600000e+01 : f32
    %276 = vector.broadcast %cst_96 : f32 to vector<1x32xf32>
    %277 = arith.divf %275, %276 : vector<1x32xf32>
    %278 = tpu.concatenate %272, %277 in 0 : vector<1x32xf32>, vector<1x32xf32> -> vector<2x32xf32>
    %c64_97 = arith.constant 64 : index
    %c0_98 = arith.constant 0 : index
    %279 = vector.load %arg3[%c64_97, %c0_98] : memref<96x128xbf16, #tpu.memory_space<vmem>>, vector<32x128xbf16>
    %280 = arith.truncf %278 : vector<2x32xf32> to vector<2x32xbf16>
    %cst_99 = arith.constant dense<0.000000e+00> : vector<2x128xf32>
    %281 = tpu.matmul %280, %279, %cst_99 {dimension_numbers = #tpu.dot_dimension_numbers<[1], [0], [0], [1], [0, 0, 1, 1], [], []>} : vector<2x32xbf16>, vector<32x128xbf16>, vector<2x128xf32> -> vector<2x128xf32>
    %c16 = arith.constant 16 : index
    %c0_100 = arith.constant 0 : index
    %282 = vector.load %arg1[%c16, %c0_100] : memref<72x128xf32, #tpu.memory_space<vmem>>, vector<1x128xf32>
    %283 = vector.broadcast %282 : vector<1x128xf32> to vector<2x128xf32>
    %284 = arith.addf %281, %283 : vector<2x128xf32>
    %c0_101 = arith.constant 0 : index
    %c0_102 = arith.constant 0 : index
    %285 = vector.load %arg4[%c0_101, %c0_102] : memref<2x128xf32, #tpu.memory_space<vmem>>, vector<2x128xf32>
    tpu.vector_store %arg4[%c0_101, %c0_102], %284 {strides = array<i32>} : memref<2x128xf32, #tpu.memory_space<vmem>>, vector<2x128xf32>,
    return
  }
}

</mosaic_0001>

<bundles_post_ra>
// kernel: vit_forward.1
= control target key start
LH: loop header
LB: loop body
LE: loop exit
PB: predicated region body
PF: predicated region fallthrough
CT: control target
= control target key end

     0   :  { %vm25_vm0 = vcmask 523264   ;;  %s3193_s0 = inlined_call_operand.vmem [shape: f32[32,64], index: 0, kind: input, shape index: {}]   ;;  %s3194_s1 = inlined_call_operand.vmem [shape: f32[72,128], index: 1, kind: input, shape index: {}]   ;;  %s3195_s2 = inlined_call_operand.vmem [shape: bf16[448,32], index: 2, kind: input, shape index: {}]   ;;  %s3196_s3 = inlined_call_operand.vmem [shape: bf16[96,128], index: 3, kind: input, shape index: {}]   ;;  %s3197_s4 = inlined_call_operand.hbm [shape: f32[2,128], index: 4, kind: output, shape index: {}]  }
   0x1   :  { %v2698_v0 = vld [vmem:[%s3193_s0 + $0x10] sm:$0xff]  ;;  %v2703_v1 = vld [vmem:[%s3193_s0] sm:$0xff]  ;;  %v2708_v2 = vld [vmem:[%s3193_s0 + $0x18] sm:$0xff] }
   0x2   :  { %v32_v3 = vsel %vm25_vm0, %v2698_v0, 0.0  ;;  %v26_v4 = vsel %vm25_vm0, %v2703_v1, 0.0  ;;  %v2717_v5 = vld [vmem:[%s3193_s0 + $0x8] sm:$0xff]  ;;  %v43_v6 = vmul.f32 %v2703_v1, %v2703_v1  ;;  %v46_v8 = vmul.f32 %v2708_v2, %v2708_v2 }
   0x3   :  { %33 = vadd.xlane.f32.xlu1 %v32_v3  ;;  %27 = vadd.xlane.f32.xlu0 %v26_v4  ;;  %v44_v7 = vmul.f32 %v2717_v5, %v2717_v5  ;;  %v45_v9 = vmul.f32 %v2698_v0, %v2698_v0  ;;  %v35_v10 = vsel %vm25_vm0, %v2708_v2, 0.0  ;;  %v29_v11 = vsel %vm25_vm0, %v2717_v5, 0.0 }
   0x4   :  { %v47_v13 = vsel %vm25_vm0, %v43_v6, 0.0  ;;  %v56_v14 = vsel %vm25_vm0, %v46_v8, 0.0 }
   0x5   :  { %v50_v12 = vsel %vm25_vm0, %v44_v7, 0.0  ;;  %v53_v15 = vsel %vm25_vm0, %v45_v9, 0.0 }
   0x7   :  { %36 = vadd.xlane.f32.xlu1 %v35_v10  ;;  %30 = vadd.xlane.f32.xlu0 %v29_v11 }
   0xb   :  { %51 = vadd.xlane.f32.xlu1 %v50_v12  ;;  %48 = vadd.xlane.f32.xlu0 %v47_v13 }
   0xf   :  { %57 = vadd.xlane.f32.xlu1 %v56_v14  ;;  %54 = vadd.xlane.f32.xlu0 %v53_v15 }
  0x10   :  { %9 = vsyncpa [#allocation3], 0  ;;  %v2545_v16 = vld [vmem:[%s3195_s2] sm:$0xff]   ;;  %v2546_v17 = vld [vmem:[%s3195_s2 + $0x8] sm:$0xff]   ;;  %vm194_vm1 = vcmask 261120   ;;  %vm593_vm2 = vcmask 130048  }
  0x11   :  { %2361 = vmatprep.subr.bf16.mxu0 %v2545_v16  ;;  %v2547_v18 = vld [vmem:[%s3195_s2 + $0x10] sm:$0xff]   ;;  %v2548_v19 = vld [vmem:[%s3195_s2 + $0x18] sm:$0xff]   ;;  %v2186_v51 = vld [vmem:[%s3194_s1] ss:$0 sm:$0xff]  ;;  %vm2668_vm3 = vmmov 0   ;;  %vm2104_vm4 = vcmask 1040384  }
  0x12   :  { %2362 = vmatpush3.bf16.msra.mxu0 %v2545_v16  ;;  %v2187_v54 = vld [vmem:[%s3194_s1 + $0x1] ss:$0 sm:$0xff]  ;;  %s2669_s26 = smov [#allocation2]  }
  0x13   :  { %2363 = vmatprep.subr.bf16.mxu0 %v2546_v17  ;;  %s2178_s27 = sshll.u32 %s2669_s26, 4  ;;  %s2179_s27 = int_to_ptr.vmem [resolvable:$true] %s2178_s27 }
  0x14   :  { %s2643_s28 = scalar_lea.vmem %s2179_s27, 32  ;;  %p2648_p1 = scmp.lt.s32.totalorder %s2179_s27, %s2179_s27 }
  0x15   :  { %p2644_p0 = scmp.ne.s32.totalorder %s2179_s27, %s2643_s28  ;;  %p2649_p2 = scmp.lt.s32.totalorder %s2643_s28, %s2643_s28 }
  0x16   :  { %2364 = vmatpush3.bf16.msra.mxu0 %v2546_v17 }
  0x17   :  { %2365 = vmatprep.subr.bf16.mxu0 %v2547_v18  ;;  %p2650_p3 = por %p2649_p2, %p2648_p1 }
  0x19   :  { %p2651_p4 = pnand %p2650_p3, %p2644_p0 }
  0x1a   :  { %2366 = vmatpush3.bf16.msra.mxu0 %v2547_v18 }
  0x1b   :  { %2367 = vmatprep.subr.bf16.mxu0 %v2548_v19 }
  0x1e   :  { %2368 = vmatpush3.bf16.msra.mxu0 %v2548_v19 }
  0x90   :  { %v34_v20 = vpop.xlane.xlu1 %33  ;;  %v28_v21 = vpop.xlane.xlu0 %27 }
  0x91   :  { %v39_v24 = vmul.f32 0.015625, %v28_v21  ;;  %v41_v26 = vmul.f32 0.015625, %v34_v20 }
  0x93   :  { %v63_v30 = vmul.f32 %v39_v24, %v39_v24  ;;  %v65_v36 = vmul.f32 %v41_v26, %v41_v26  ;;  %v79_v50 = vsub.f32 %v2703_v1, %v39_v24  ;;  %v81_v59 = vsub.f32 %v2698_v0, %v41_v26 }
  0x94   :  { %v37_v22 = vpop.xlane.xlu1 %36  ;;  %v31_v23 = vpop.xlane.xlu0 %30 }
  0x95   :  { %v40_v25 = vmul.f32 0.015625, %v31_v23  ;;  %v42_v27 = vmul.f32 0.015625, %v37_v22 }
  0x97   :  { %v64_v31 = vmul.f32 %v40_v25, %v40_v25  ;;  %v66_v37 = vmul.f32 %v42_v27, %v42_v27  ;;  %v80_v48 = vsub.f32 %v2717_v5, %v40_v25  ;;  %v82_v56 = vsub.f32 %v2708_v2, %v42_v27 }
  0x98   :  { %v52_v28 = vpop.xlane.xlu1 %51  ;;  %v49_v29 = vpop.xlane.xlu0 %48 }
  0x99   :  { %v60_v32 = vmul.f32 0.015625, %v52_v28  ;;  %v59_v33 = vmul.f32 0.015625, %v49_v29 }
  0x9b   :  { %v68_v34 = vsub.f32 %v60_v32, %v64_v31  ;;  %v67_v35 = vsub.f32 %v59_v33, %v63_v30 }
  0x9c   :  { %v58_v38 = vpop.xlane.xlu1 %57  ;;  %v55_v39 = vpop.xlane.xlu0 %54 }
  0x9d   :  { %v72_v40 = vadd.f32 1e-05, %v68_v34  ;;  %v71_v41 = vadd.f32 1e-05, %v67_v35  ;;  %v62_v42 = vmul.f32 0.015625, %v58_v38  ;;  %v61_v43 = vmul.f32 0.015625, %v55_v39 }
  0x9f   :  { %2579 = vrsqrt.f32 %v72_v40  ;;  %v70_v44 = vsub.f32 %v62_v42, %v66_v37  ;;  %v69_v45 = vsub.f32 %v61_v43, %v65_v36 }
  0xa0   :  { %2581 = vrsqrt.f32 %v71_v41 }
  0xa1   :  { %v74_v46 = vadd.f32 1e-05, %v70_v44  ;;  %v73_v47 = vadd.f32 1e-05, %v69_v45 }
  0xa3   :  { %2583 = vrsqrt.f32 %v74_v46 }
  0xa4   :  { %2585 = vrsqrt.f32 %v73_v47 }
  0xa9   :  { %v2580_v49 = vpop.eup %2579 }
  0xaa   :  { %v2582_v52 = vpop.eup %2581  ;;  %v84_v53 = vmul.f32 %v2580_v49, %v80_v48 }
  0xab   :  { %v83_v55 = vmul.f32 %v2582_v52, %v79_v50 }
  0xac   :  { %v92_v57 = vmul.f32 %v2186_v51, %v84_v53 }
  0xad   :  { %v2584_v58 = vpop.eup %2583  ;;  %v91_v60 = vmul.f32 %v2186_v51, %v83_v55 }
  0xae   :  { %v2586_v61 = vpop.eup %2585  ;;  %v100_v62 = vadd.f32 %v2187_v54, %v92_v57  ;;  %v86_v63 = vmul.f32 %v2584_v58, %v82_v56  ;;  %v2194_v57 = vld [vmem:[%s3194_s1 + $0x2] ss:$0 sm:$0xff] }
  0xaf   :  { %v99_v1 = vadd.f32 %v2187_v54, %v91_v60  ;;  %v85_v3 = vmul.f32 %v2586_v61, %v81_v59 }
  0xb0   :  { %v94_v4 = vmul.f32 %v2186_v51, %v86_v63 }
  0xb1   :  { %v111_v5 = vpack.c.bf16 %v100_v62, %v99_v1  ;;  %v93_v6 = vmul.f32 %v2186_v51, %v85_v3  ;;  %v2195_v3 = vld [vmem:[%s3194_s1 + $0x3] ss:$0 sm:$0xff] }
  0xb2   :  { %v102_v7 = vadd.f32 %v2187_v54, %v94_v4 }
  0xb3   :  { %2369 = vmatprep.mubr.msk.bf16.mxu0 %vm25_vm0, %v111_v5  ;;  %v101_v8 = vadd.f32 %v2187_v54, %v93_v6 }
  0xb5   :  { %v112_v9 = vpack.c.bf16 %v102_v7, %v101_v8 }
  0xb7   :  { %2370 = vmatmul.mubr.msk.bf16.vlgmr.msra.gmra.mrb[0].mxu0 %vm25_vm0, %v112_v9 }
 0x18a   :  { %v2759_v2 = vpop.f32.mrb[0].mxu0 }
 0x18b   :  { %v177_v0 = vpop.f32.mrb[1].mxu0  ;;  %v201_v10 = vsel %vm194_vm1, %v2759_v2, 0.0  ;;  %v214_v19 = vmul.f32 %v2759_v2, %v2759_v2 }
 0x18c   :  { %202 = vadd.xlane.f32.xlu0 %v201_v10  ;;  %v2763_v11 = vpop.f32.mrb[2].mxu0  ;;  %v195_v14 = vsel %vm194_vm1, %v177_v0, 0.0  ;;  %v212_v15 = vmul.f32 %v177_v0, %v177_v0 }
 0x18d   :  { %v180_v12 = vpop.f32.mrb[3].mxu0  ;;  %v204_v13 = vsel %vm194_vm1, %v2763_v11, 0.0  ;;  %v215_v21 = vmul.f32 %v2763_v11, %v2763_v11  ;;  %v222_v22 = vsel %vm194_vm1, %v214_v19, 0.0 }
 0x18e   :  { %205 = vadd.xlane.f32.xlu1 %v204_v13  ;;  %v198_v16 = vsel %vm194_vm1, %v180_v12, 0.0  ;;  %v213_v17 = vmul.f32 %v180_v12, %v180_v12  ;;  %v216_v18 = vsel %vm194_vm1, %v212_v15, 0.0 }
 0x18f   :  { %v225_v23 = vsel %vm194_vm1, %v215_v21, 0.0 }
 0x190   :  { %196 = vadd.xlane.f32.xlu0 %v195_v14  ;;  %v219_v20 = vsel %vm194_vm1, %v213_v17, 0.0 }
 0x192   :  { %199 = vadd.xlane.f32.xlu1 %v198_v16 }
 0x194   :  { %217 = vadd.xlane.f32.xlu0 %v216_v18 }
 0x196   :  { %220 = vadd.xlane.f32.xlu1 %v219_v20 }
 0x198   :  { %223 = vadd.xlane.f32.xlu0 %v222_v22 }
 0x19a   :  { %226 = vadd.xlane.f32.xlu1 %v225_v23 }
 0x219   :  { %v203_v24 = vpop.xlane.xlu0 %202 }
 0x21a   :  { %v210_v31 = vmul.f32 0.03125, %v203_v24 }
 0x21b   :  { %v206_v25 = vpop.xlane.xlu1 %205 }
 0x21c   :  { %v211_v34 = vmul.f32 0.03125, %v206_v25  ;;  %v234_v40 = vmul.f32 %v210_v31, %v210_v31  ;;  %v250_v58 = vsub.f32 %v2759_v2, %v210_v31  ;;  %v272_v2 = vld [vmem:[%s3194_s1 + $0x18] sm:$0xff]  ;;  %v2552_v31 = vld [vmem:[%s3195_s2 + $0x48] sm:$0xff]  }
 0x21d   :  { %v197_v26 = vpop.xlane.xlu0 %196 }
 0x21e   :  { %v208_v27 = vmul.f32 0.03125, %v197_v26  ;;  %v235_v44 = vmul.f32 %v211_v34, %v211_v34  ;;  %v251_v61 = vsub.f32 %v2763_v11, %v211_v34 }
 0x21f   :  { %v200_v28 = vpop.xlane.xlu1 %199 }
 0x220   :  { %v209_v29 = vmul.f32 0.03125, %v200_v28  ;;  %v232_v32 = vmul.f32 %v208_v27, %v208_v27  ;;  %v248_v52 = vsub.f32 %v177_v0, %v208_v27  ;;  %v2549_v28 = vld [vmem:[%s3195_s2 + $0x20] sm:$0xff]  }
 0x221   :  { %v218_v30 = vpop.xlane.xlu0 %217  ;;  %2373 = vmatprep.subr.bf16.mxu1 %v2549_v28 }
 0x222   :  { %v228_v33 = vmul.f32 0.03125, %v218_v30  ;;  %v233_v36 = vmul.f32 %v209_v29, %v209_v29  ;;  %v249_v54 = vsub.f32 %v180_v12, %v209_v29  ;;  %v273_v12 = vld [vmem:[%s3194_s1 + $0x20] sm:$0xff]  ;;  %v2551_v30 = vld [vmem:[%s3195_s2 + $0x28] sm:$0xff]   ;;  %2374 = vmatpush3.bf16.msra.mxu1 %v2549_v28 }
 0x223   :  { %v221_v35 = vpop.xlane.xlu1 %220  ;;  %v2550_v29 = vld [vmem:[%s3195_s2 + $0x40] sm:$0xff]   ;;  %2375 = vmatprep.subr.bf16.mxu1 %v2551_v30 }
 0x224   :  { %v236_v37 = vsub.f32 %v228_v33, %v232_v32  ;;  %v229_v38 = vmul.f32 0.03125, %v221_v35  ;;  %2389 = vmatprep.subr.bf16.mxu0 %v2550_v29  ;;  %v2834_v32 = vld [vmem:[%s3195_s2 + $0x30] sm:$0xff]  }
 0x225   :  { %v224_v39 = vpop.xlane.xlu0 %223  ;;  %2390 = vmatpush3.bf16.msra.mxu0 %v2550_v29 }
 0x226   :  { %v240_v41 = vadd.f32 1e-05, %v236_v37  ;;  %v237_v42 = vsub.f32 %v229_v38, %v233_v36  ;;  %v230_v43 = vmul.f32 0.03125, %v224_v39  ;;  %2376 = vmatpush3.bf16.msra.mxu1 %v2551_v30  ;;  %2391 = vmatprep.subr.bf16.mxu0 %v2552_v31 }
 0x227   :  { %v227_v45 = vpop.xlane.xlu1 %226  ;;  %2381 = vmatprep.subr.bf16.mxu1 %v2834_v32 }
 0x228   :  { %2587 = vrsqrt.f32 %v240_v41  ;;  %v241_v46 = vadd.f32 1e-05, %v237_v42  ;;  %v238_v47 = vsub.f32 %v230_v43, %v234_v40  ;;  %v231_v48 = vmul.f32 0.03125, %v227_v45 }
 0x229   :  { %2392 = vmatpush3.bf16.msra.mxu0 %v2552_v31 }
 0x22a   :  { %2589 = vrsqrt.f32 %v241_v46  ;;  %v242_v49 = vadd.f32 1e-05, %v238_v47  ;;  %v239_v50 = vsub.f32 %v231_v48, %v235_v44 }
 0x22c   :  { %2591 = vrsqrt.f32 %v242_v49  ;;  %v243_v51 = vadd.f32 1e-05, %v239_v50 }
 0x22e   :  { %2593 = vrsqrt.f32 %v243_v51 }
 0x232   :  { %v2588_v53 = vpop.eup %2587 }
 0x233   :  { %v252_v55 = vmul.f32 %v2588_v53, %v248_v52 }
 0x234   :  { %v2590_v56 = vpop.eup %2589 }
 0x235   :  { %v253_v59 = vmul.f32 %v2590_v56, %v249_v54  ;;  %v260_v63 = vmul.f32 %v2194_v57, %v252_v55 }
 0x236   :  { %v2592_v60 = vpop.eup %2591 }
 0x237   :  { %v254_v62 = vmul.f32 %v2592_v60, %v250_v58  ;;  %v261_v6 = vmul.f32 %v2194_v57, %v253_v59  ;;  %v268_v9 = vadd.f32 %v2195_v3, %v260_v63  ;;  %v2196_v63 = vld [vmem:[%s3194_s1 + $0x4] ss:$0 sm:$0xff] }
 0x238   :  { %v2594_v1 = vpop.eup %2593 }
 0x239   :  { %v262_v4 = vmul.f32 %v2194_v57, %v254_v62  ;;  %v255_v5 = vmul.f32 %v2594_v1, %v251_v61  ;;  %v269_v11 = vadd.f32 %v2195_v3, %v261_v6  ;;  %v2797_v15 = vadd.f32 %v272_v2, %v268_v9  ;;  %v2197_v9 = vld [vmem:[%s3194_s1 + $0x5] ss:$0 sm:$0xff] }
 0x23b   :  { %v270_v7 = vadd.f32 %v2195_v3, %v262_v4  ;;  %v263_v8 = vmul.f32 %v2194_v57, %v255_v5  ;;  %v2801_v17 = vadd.f32 %v273_v12, %v269_v11  ;;  %v284_v18 = vsel %vm194_vm1, %v2797_v15, 0.0 }
 0x23c   :  { %v300_v19 = vmul.f32 %v2797_v15, %v2797_v15 }
 0x23d   :  { %v2788_v0 = vadd.f32 %v272_v2, %v270_v7  ;;  %v271_v10 = vadd.f32 %v2195_v3, %v263_v8  ;;  %v287_v20 = vsel %vm194_vm1, %v2801_v17, 0.0  ;;  %v301_v21 = vmul.f32 %v2801_v17, %v2801_v17 }
 0x23e   :  { %v304_v22 = vsel %vm194_vm1, %v300_v19, 0.0 }
 0x23f   :  { %v290_v13 = vsel %vm194_vm1, %v2788_v0, 0.0  ;;  %v2795_v14 = vadd.f32 %v273_v12, %v271_v10  ;;  %v302_v23 = vmul.f32 %v2788_v0, %v2788_v0  ;;  %v307_v24 = vsel %vm194_vm1, %v301_v21, 0.0 }
 0x240   :  { %291 = vadd.xlane.f32.xlu0 %v290_v13 }
 0x241   :  { %v293_v16 = vsel %vm194_vm1, %v2795_v14, 0.0  ;;  %v303_v25 = vmul.f32 %v2795_v14, %v2795_v14  ;;  %v310_v26 = vsel %vm194_vm1, %v302_v23, 0.0 }
 0x242   :  { %294 = vadd.xlane.f32.xlu1 %v293_v16 }
 0x243   :  { %v313_v27 = vsel %vm194_vm1, %v303_v25, 0.0  ;;  %v2554_v25 = vld [vmem:[%s3195_s2 + $0x38] sm:$0xff]  }
 0x244   :  { %285 = vadd.xlane.f32.xlu0 %v284_v18 }
 0x246   :  { %288 = vadd.xlane.f32.xlu1 %v287_v20 }
 0x248   :  { %305 = vadd.xlane.f32.xlu0 %v304_v22 }
 0x24a   :  { %308 = vadd.xlane.f32.xlu1 %v307_v24 }
 0x24c   :  { %311 = vadd.xlane.f32.xlu0 %v310_v26 }
 0x24e   :  { %314 = vadd.xlane.f32.xlu1 %v313_v27 }
 0x2cd   :  { %v292_v33 = vpop.xlane.xlu0 %291 }
 0x2ce   :  { %v298_v40 = vmul.f32 0.03125, %v292_v33 }
 0x2cf   :  { %v295_v34 = vpop.xlane.xlu1 %294 }
 0x2d0   :  { %v299_v43 = vmul.f32 0.03125, %v295_v34  ;;  %v322_v49 = vmul.f32 %v298_v40, %v298_v40  ;;  %v338_v5 = vsub.f32 %v2788_v0, %v298_v40 }
 0x2d1   :  { %v286_v35 = vpop.xlane.xlu0 %285 }
 0x2d2   :  { %v296_v36 = vmul.f32 0.03125, %v286_v35  ;;  %v323_v53 = vmul.f32 %v299_v43, %v299_v43  ;;  %v339_v2 = vsub.f32 %v2795_v14, %v299_v43 }
 0x2d3   :  { %v289_v37 = vpop.xlane.xlu1 %288 }
 0x2d4   :  { %v297_v38 = vmul.f32 0.03125, %v289_v37  ;;  %v320_v41 = vmul.f32 %v296_v36, %v296_v36  ;;  %v336_v61 = vsub.f32 %v2797_v15, %v296_v36 }
 0x2d5   :  { %v306_v39 = vpop.xlane.xlu0 %305 }
 0x2d6   :  { %v316_v42 = vmul.f32 0.03125, %v306_v39  ;;  %v321_v45 = vmul.f32 %v297_v38, %v297_v38  ;;  %v337_v1 = vsub.f32 %v2801_v17, %v297_v38 }
 0x2d7   :  { %v309_v44 = vpop.xlane.xlu1 %308 }
 0x2d8   :  { %v324_v46 = vsub.f32 %v316_v42, %v320_v41  ;;  %v317_v47 = vmul.f32 0.03125, %v309_v44 }
 0x2d9   :  { %v312_v48 = vpop.xlane.xlu0 %311 }
 0x2da   :  { %v328_v50 = vadd.f32 1e-05, %v324_v46  ;;  %v325_v51 = vsub.f32 %v317_v47, %v321_v45  ;;  %v318_v52 = vmul.f32 0.03125, %v312_v48  ;;  %v2667_v48 = vmov 0.0  }
 0x2db   :  { %v315_v54 = vpop.xlane.xlu1 %314  ;;  %2403 = vmatprep.subr.bf16.mxu0 %v2667_v48 }
 0x2dc   :  { %2595 = vrsqrt.f32 %v328_v50  ;;  %v329_v55 = vadd.f32 1e-05, %v325_v51  ;;  %v326_v56 = vsub.f32 %v318_v52, %v322_v49  ;;  %v319_v57 = vmul.f32 0.03125, %v315_v54  ;;  %v2876_v49 = vld [vmem:[%s3194_s1 + $0x38] sm:$0xff]  ;;  %v2881_v51 = vld [vmem:[%s3194_s1 + $0x40] sm:$0xff]  ;;  %v2886_v52 = vld [vmem:[%s3194_s1 + $0x28] sm:$0xff] }
 0x2dd   :  { %v2891_v54 = vld [vmem:[%s3194_s1 + $0x30] sm:$0xff] }
 0x2de   :  { %2597 = vrsqrt.f32 %v329_v55  ;;  %v330_v58 = vadd.f32 1e-05, %v326_v56  ;;  %v327_v59 = vsub.f32 %v319_v57, %v323_v53 }
 0x2e0   :  { %2599 = vrsqrt.f32 %v330_v58  ;;  %v331_v60 = vadd.f32 1e-05, %v327_v59 }
 0x2e2   :  { %2601 = vrsqrt.f32 %v331_v60 }
 0x2e6   :  { %v2596_v62 = vpop.eup %2595 }
 0x2e7   :  { %v340_v3 = vmul.f32 %v2596_v62, %v336_v61 }
 0x2e8   :  { %v2598_v4 = vpop.eup %2597 }
 0x2e9   :  { %v341_v6 = vmul.f32 %v2598_v4, %v337_v1  ;;  %v348_v7 = vmul.f32 %v2196_v63, %v340_v3 }
 0x2ea   :  { %v2600_v8 = vpop.eup %2599 }
 0x2eb   :  { %v349_v10 = vmul.f32 %v2196_v63, %v341_v6  ;;  %v342_v11 = vmul.f32 %v2600_v8, %v338_v5  ;;  %v356_v13 = vadd.f32 %v2197_v9, %v348_v7 }
 0x2ec   :  { %v2602_v12 = vpop.eup %2601 }
 0x2ed   :  { %v357_v16 = vadd.f32 %v2197_v9, %v349_v10  ;;  %v343_v18 = vmul.f32 %v2602_v12, %v339_v2  ;;  %v350_v19 = vmul.f32 %v2196_v63, %v342_v11  ;;  %v2555_v10 = vld [vmem:[%s3195_s2 + $0x50] sm:$0xff]   ;;  %v2556_v11 = vld [vmem:[%s3195_s2 + $0x58] sm:$0xff]  }
 0x2ef   :  { %v360_v20 = vpack.c.bf16 %v357_v16, %v356_v13  ;;  %v351_v21 = vmul.f32 %v2196_v63, %v343_v18  ;;  %v358_v22 = vadd.f32 %v2197_v9, %v350_v19 }
 0x2f1   :  { %2377 = vmatprep.mubr.msk.bf16.mxu1 %vm194_vm1, %v360_v20  ;;  %2393 = vmatprep.mubr.msk.bf16.mxu0 %vm194_vm1, %v360_v20  ;;  %v359_v23 = vadd.f32 %v2197_v9, %v351_v21 }
 0x2f3   :  { %v361_v24 = vpack.c.bf16 %v359_v23, %v358_v22 }
 0x2f5   :  { %2378 = vmatmul.mubr.msk.bf16.vlgmr.msra.gmra.mrb[0].mxu1 %vm194_vm1, %v361_v24  ;;  %2394 = vmatmul.mubr.msk.bf16.vlgmr.msra.gmra.mrb[4].mxu0 %vm194_vm1, %v361_v24 }
 0x2f6   :  { %2382 = vmatpush3.bf16.msra.mxu1 %v2834_v32  ;;  %2385 = vmatprep.mubr.msk.bf16.mxu1 %vm194_vm1, %v360_v20 }
 0x2f7   :  { %2383 = vmatprep.subr.bf16.mxu1 %v2554_v25  ;;  %2407 = vmatprep.mubr.msk.bf16.mxu0 %vm2668_vm3, %v2667_v48 }
 0x2fa   :  { %2384 = vmatpush3.bf16.msra.mxu1 %v2554_v25 }
 0x2fd   :  { %2386 = vmatmul.mubr.msk.bf16.vlgmr.msra.gmra.mrb[4].mxu1 %vm194_vm1, %v361_v24 }
 0x3c8   :  { %v2857_v26 = vpop.f32.mrb[0].mxu1  ;;  %v2395_v27 = vpop.f32.mrb[4].mxu0 }
 0x3c9   :  { %v2859_v28 = vpop.f32.mrb[1].mxu1  ;;  %v560_v29 = vpop.f32.mrb[5].mxu0 }
 0x3ca   :  { %v2861_v30 = vpop.f32.mrb[2].mxu1  ;;  %v2396_v31 = vpop.f32.mrb[6].mxu0 }
 0x3cb   :  { %v779_v33 = vpack.c.bf16 %v2861_v30, %v2857_v26  ;;  %v701_v34 = vpack.c.bf16 %v2396_v31, %v2395_v27  ;;  %v441_v32 = vpop.f32.mrb[3].mxu1  ;;  %v563_v35 = vpop.f32.mrb[7].mxu0 }
 0x3cc   :  { %v655_v36 = vpack.c.bf16 %v441_v32, %v2859_v28  ;;  %v576_v37 = vpack.c.bf16 %v563_v35, %v560_v29 }
 0x3ce   :  { %2397 = vmatprep.subr.bf16.mxu1 %v576_v37 }
 0x3cf   :  { %2398 = vmatpush3.bf16.msra.mxu1 %v576_v37 }
 0x3d0   :  { %v2387_v38 = vpop.f32.mrb[4].mxu1  ;;  %2411 = vmatprep.subr.bf16.mxu1 %v701_v34 }
 0x3d1   :  { %v499_v39 = vpop.f32.mrb[5].mxu1 }
 0x3d2   :  { %v2388_v40 = vpop.f32.mrb[6].mxu1 }
 0x3d3   :  { %v700_v41 = vpack.c.bf16 %v2388_v40, %v2387_v38  ;;  %v502_v42 = vpop.f32.mrb[7].mxu1 }
 0x3d4   :  { %v575_v43 = vpack.c.bf16 %v502_v42, %v499_v39  ;;  %v2558_v42 = vld [vmem:[%s3196_s3 + $0x8] sm:$0xff]  }
 0x3d5   :  { %702 = vxpose.xlu1.c.b16.start.end [1/1] (short) (narrow) %v700_v41, 32  ;;  %v2557_v41 = vld [vmem:[%s3196_s3] sm:$0xff]  }
 0x3d6   :  { %577 = vxpose.xlu0.c.b16.start.end [1/1] (short) (narrow) %v575_v43, 32 }
 0x43b   :  { %v710_v45 = vpop.trf.xlu1 }
 0x43c   :  { %v585_v44 = vpop.trf.xlu0 }
 0x43d   :  { %2399 = vmatprep.mubr.msk.bf16.mxu1 %vm593_vm2, %v585_v44 }
 0x43f   :  { %v711_v47 = vpop.trf.xlu1 }
 0x440   :  { %v586_v46 = vpop.trf.xlu0 }
 0x441   :  { %2400 = vmatmul.mubr.msk.bf16.vlgmr.msra.gmra.mrb[8].mxu1 %vm593_vm2, %v586_v46 }
 0x442   :  { %2412 = vmatpush3.bf16.msra.mxu1 %v701_v34  ;;  %2413 = vmatprep.mubr.msk.bf16.mxu1 %vm593_vm2, %v710_v45 }
 0x443   :  { %2425 = vmatprep.subr.bf16.mxu1 %v2555_v10 }
 0x449   :  { %2414 = vmatmul.mubr.msk.bf16.vlgmr.msra.gmra.mrb[12].mxu1 %vm593_vm2, %v711_v47 }
 0x44a   :  { %2426 = vmatpush3.bf16.msra.mxu1 %v2555_v10 }
 0x44b   :  { %2427 = vmatprep.subr.bf16.mxu1 %v2556_v11 }
 0x44e   :  { %2428 = vmatpush3.bf16.msra.mxu1 %v2556_v11 }
 0x514   :  { %v2401_v50 = vpop.f32.mrb[8].mxu1 }
 0x515   :  { %v634_v53 = vpop.f32.mrb[9].mxu1  ;;  %v651_v56 = vmul.f32 %v2401_v50, %v2876_v49 }
 0x516   :  { %v2402_v55 = vpop.f32.mrb[10].mxu1  ;;  %v649_v59 = vmul.f32 %v634_v53, %v2886_v52 }
 0x517   :  { %v652_v57 = vmul.f32 %v2402_v55, %v2881_v51  ;;  %v637_v58 = vpop.f32.mrb[11].mxu1 }
 0x518   :  { %v650_v60 = vmul.f32 %v637_v58, %v2891_v54 }
 0x519   :  { %v654_v61 = vpack.c.bf16 %v652_v57, %v651_v56 }
 0x51a   :  { %v653_v62 = vpack.c.bf16 %v650_v60, %v649_v59 }
 0x51c   :  { %2404 = vmatpush3.bf16.msra.mxu0 %v653_v62  ;;  %v2415_v63 = vpop.f32.mrb[12].mxu1 }
 0x51d   :  { %v758_v1 = vpop.f32.mrb[13].mxu1  ;;  %2405 = vmatprep.subr.bf16.mxu0 %v2667_v48  ;;  %v775_v4 = vmul.f32 %v2415_v63, %v2876_v49 }
 0x51e   :  { %v2416_v3 = vpop.f32.mrb[14].mxu1  ;;  %v773_v7 = vmul.f32 %v758_v1, %v2886_v52 }
 0x51f   :  { %v776_v5 = vmul.f32 %v2416_v3, %v2881_v51  ;;  %v761_v6 = vpop.f32.mrb[15].mxu1 }
 0x520   :  { %v774_v8 = vmul.f32 %v761_v6, %v2891_v54  ;;  %2406 = vmatpush3.bf16.msra.mxu0 %v654_v61 }
 0x521   :  { %v778_v9 = vpack.c.bf16 %v776_v5, %v775_v4  ;;  %2417 = vmatprep.subr.bf16.mxu0 %v2667_v48 }
 0x522   :  { %v777_v2 = vpack.c.bf16 %v774_v8, %v773_v7 }
 0x523   :  { %2408 = vmatmul.mubr.msk.bf16.vlgmr.msra.gmra.mrb[8].mxu0 %vm194_vm1, %v655_v36 }
 0x524   :  { %2418 = vmatpush3.bf16.msra.mxu0 %v777_v2  ;;  %2421 = vmatprep.mubr.msk.bf16.mxu0 %vm2668_vm3, %v2667_v48 }
 0x525   :  { %2419 = vmatprep.subr.bf16.mxu0 %v2667_v48 }
 0x528   :  { %2420 = vmatpush3.bf16.msra.mxu0 %v778_v9 }
 0x529   :  { %2433 = vmatprep.subr.bf16.mxu0 %v2557_v41 }
 0x52b   :  { %2422 = vmatmul.mubr.msk.bf16.vlgmr.msra.gmra.mrb[12].mxu0 %vm194_vm1, %v779_v33 }
 0x52c   :  { %2434 = vmatpush3.bf16.msra.mxu0 %v2557_v41  ;;  %v2560_v41 = vld [vmem:[%s3195_s2 + $0x68] sm:$0xff]  }
 0x52d   :  { %2435 = vmatprep.subr.bf16.mxu0 %v2558_v42 }
 0x530   :  { %2436 = vmatpush3.bf16.msra.mxu0 %v2558_v42  ;;  %v2561_v42 = vld [vmem:[%s3195_s2 + $0x70] sm:$0xff]  }
 0x5f6   :  { %v693_v12 = vpop.f32.mrb[8].mxu0 }
 0x5f7   :  { %v2409_v13 = vpop.f32.mrb[9].mxu0 }
 0x5f8   :  { %v696_v16 = vpop.f32.mrb[10].mxu0 }
 0x5f9   :  { %v824_v18 = vpack.c.bf16 %v696_v16, %v693_v12  ;;  %v2410_v19 = vpop.f32.mrb[11].mxu0 }
 0x5fb   :  { %2429 = vmatprep.mubr.msk.bf16.mxu1 %vm194_vm1, %v824_v18  ;;  %v2220_v18 = vld [vmem:[%s3194_s1 + $0x6] ss:$0 sm:$0xff] }
 0x5fe   :  { %v817_v20 = vpop.f32.mrb[12].mxu0 }
 0x5ff   :  { %v2423_v21 = vpop.f32.mrb[13].mxu0 }
 0x600   :  { %v820_v22 = vpop.f32.mrb[14].mxu0 }
 0x601   :  { %v825_v23 = vpack.c.bf16 %v820_v22, %v817_v20  ;;  %v2424_v24 = vpop.f32.mrb[15].mxu0 }
 0x603   :  { %2430 = vmatmul.mubr.msk.bf16.vlgmr.msra.gmra.mrb[16].mxu1 %vm194_vm1, %v825_v23 }
 0x6d6   :  { %v2431_v25 = vpop.f32.mrb[16].mxu1 }
 0x6d7   :  { %v2920_v26 = vadd.f32 %v2431_v25, %v2788_v0  ;;  %v878_v27 = vpop.f32.mrb[17].mxu1 }
 0x6d8   :  { %v2432_v28 = vpop.f32.mrb[18].mxu1  ;;  %v2923_v29 = vadd.f32 %v878_v27, %v2797_v15  ;;  %v2221_v27 = vld [vmem:[%s3194_s1 + $0x7] ss:$0 sm:$0xff] }
 0x6d9   :  { %v2926_v30 = vadd.f32 %v2432_v28, %v2795_v14  ;;  %v881_v31 = vpop.f32.mrb[19].mxu1  ;;  %v905_v33 = vsel %vm194_vm1, %v2920_v26, 0.0  ;;  %v917_v36 = vmul.f32 %v2920_v26, %v2920_v26 }
 0x6da   :  { %906 = vadd.xlane.f32.xlu0 %v905_v33  ;;  %v2931_v34 = vadd.f32 %v881_v31, %v2801_v17  ;;  %v899_v32 = vsel %vm194_vm1, %v2923_v29, 0.0  ;;  %v915_v15 = vmul.f32 %v2923_v29, %v2923_v29 }
 0x6db   :  { %v908_v0 = vsel %vm194_vm1, %v2926_v30, 0.0  ;;  %v918_v38 = vmul.f32 %v2926_v30, %v2926_v30  ;;  %v925_v39 = vsel %vm194_vm1, %v917_v36, 0.0 }
 0x6dc   :  { %909 = vadd.xlane.f32.xlu1 %v908_v0  ;;  %v902_v14 = vsel %vm194_vm1, %v2931_v34, 0.0  ;;  %v916_v35 = vmul.f32 %v2931_v34, %v2931_v34  ;;  %v919_v17 = vsel %vm194_vm1, %v915_v15, 0.0 }
 0x6dd   :  { %v928_v40 = vsel %vm194_vm1, %v918_v38, 0.0 }
 0x6de   :  { %900 = vadd.xlane.f32.xlu0 %v899_v32  ;;  %v922_v37 = vsel %vm194_vm1, %v916_v35, 0.0 }
 0x6e0   :  { %903 = vadd.xlane.f32.xlu1 %v902_v14 }
 0x6e2   :  { %920 = vadd.xlane.f32.xlu0 %v919_v17 }
 0x6e4   :  { %923 = vadd.xlane.f32.xlu1 %v922_v37 }
 0x6e6   :  { %926 = vadd.xlane.f32.xlu0 %v925_v39 }
 0x6e8   :  { %929 = vadd.xlane.f32.xlu1 %v928_v40  ;;  %v2559_v40 = vld [vmem:[%s3195_s2 + $0x60] sm:$0xff]  }
 0x6e9   :  { %2441 = vmatprep.subr.bf16.mxu1 %v2559_v40 }
 0x6ea   :  { %2442 = vmatpush3.bf16.msra.mxu1 %v2559_v40 }
 0x6eb   :  { %2443 = vmatprep.subr.bf16.mxu1 %v2560_v41 }
 0x6ee   :  { %2444 = vmatpush3.bf16.msra.mxu1 %v2560_v41 }
 0x6ef   :  { %2445 = vmatprep.subr.bf16.mxu1 %v2561_v42 }
 0x6f2   :  { %2446 = vmatpush3.bf16.msra.mxu1 %v2561_v42 }
 0x767   :  { %v907_v43 = vpop.xlane.xlu0 %906 }
 0x768   :  { %v913_v55 = vmul.f32 0.03125, %v907_v43  ;;  %v2562_v43 = vld [vmem:[%s3195_s2 + $0x78] sm:$0xff]  }
 0x769   :  { %v910_v44 = vpop.xlane.xlu1 %909  ;;  %2447 = vmatprep.subr.bf16.mxu1 %v2562_v43 }
 0x76a   :  { %v914_v58 = vmul.f32 0.03125, %v910_v44  ;;  %v937_v1 = vmul.f32 %v913_v55, %v913_v55  ;;  %v953_v22 = vsub.f32 %v2920_v26, %v913_v55  ;;  %2448 = vmatpush3.bf16.msra.mxu1 %v2562_v43  ;;  %v2222_v44 = vld [vmem:[%s3194_s1 + $0x8] ss:$0 sm:$0xff] }
 0x76b   :  { %v901_v45 = vpop.xlane.xlu0 %900 }
 0x76c   :  { %v911_v46 = vmul.f32 0.03125, %v901_v45  ;;  %v938_v6 = vmul.f32 %v914_v58, %v914_v58  ;;  %v954_v28 = vsub.f32 %v2926_v30, %v914_v58 }
 0x76d   :  { %v904_v47 = vpop.xlane.xlu1 %903 }
 0x76e   :  { %v912_v50 = vmul.f32 0.03125, %v904_v47  ;;  %v935_v56 = vmul.f32 %v911_v46, %v911_v46  ;;  %v951_v13 = vsub.f32 %v2923_v29, %v911_v46 }
 0x76f   :  { %v921_v53 = vpop.xlane.xlu0 %920 }
 0x770   :  { %v931_v57 = vmul.f32 0.03125, %v921_v53  ;;  %v936_v60 = vmul.f32 %v912_v50, %v912_v50  ;;  %v952_v19 = vsub.f32 %v2931_v34, %v912_v50 }
 0x771   :  { %v924_v59 = vpop.xlane.xlu1 %923 }
 0x772   :  { %v939_v61 = vsub.f32 %v931_v57, %v935_v56  ;;  %v932_v62 = vmul.f32 0.03125, %v924_v59 }
 0x773   :  { %v927_v63 = vpop.xlane.xlu0 %926 }
 0x774   :  { %v943_v3 = vadd.f32 1e-05, %v939_v61  ;;  %v940_v4 = vsub.f32 %v932_v62, %v936_v60  ;;  %v933_v5 = vmul.f32 0.03125, %v927_v63 }
 0x775   :  { %v930_v7 = vpop.xlane.xlu1 %929 }
 0x776   :  { %2603 = vrsqrt.f32 %v943_v3  ;;  %v944_v8 = vadd.f32 1e-05, %v940_v4  ;;  %v941_v9 = vsub.f32 %v933_v5, %v937_v1  ;;  %v934_v2 = vmul.f32 0.03125, %v930_v7 }
 0x778   :  { %2605 = vrsqrt.f32 %v944_v8  ;;  %v945_v10 = vadd.f32 1e-05, %v941_v9  ;;  %v942_v11 = vsub.f32 %v934_v2, %v938_v6 }
 0x77a   :  { %2607 = vrsqrt.f32 %v945_v10  ;;  %v946_v12 = vadd.f32 1e-05, %v942_v11 }
 0x77c   :  { %2609 = vrsqrt.f32 %v946_v12 }
 0x780   :  { %v2604_v16 = vpop.eup %2603 }
 0x781   :  { %v955_v20 = vmul.f32 %v2604_v16, %v951_v13 }
 0x782   :  { %v2606_v21 = vpop.eup %2605 }
 0x783   :  { %v956_v23 = vmul.f32 %v2606_v21, %v952_v19  ;;  %v963_v24 = vmul.f32 %v2220_v18, %v955_v20 }
 0x784   :  { %v2608_v25 = vpop.eup %2607 }
 0x785   :  { %v957_v31 = vmul.f32 %v2608_v25, %v953_v22  ;;  %v964_v33 = vmul.f32 %v2220_v18, %v956_v23  ;;  %v971_v15 = vadd.f32 %v2221_v27, %v963_v24 }
 0x786   :  { %v2610_v0 = vpop.eup %2609 }
 0x787   :  { %v958_v32 = vmul.f32 %v2610_v0, %v954_v28  ;;  %v972_v14 = vadd.f32 %v2221_v27, %v964_v33  ;;  %v965_v35 = vmul.f32 %v2220_v18, %v957_v31 }
 0x789   :  { %v979_v17 = vpack.c.bf16 %v972_v14, %v971_v15  ;;  %v966_v36 = vmul.f32 %v2220_v18, %v958_v32  ;;  %v973_v37 = vadd.f32 %v2221_v27, %v965_v35 }
 0x78b   :  { %2437 = vmatprep.mubr.msk.bf16.mxu0 %vm194_vm1, %v979_v17  ;;  %v974_v38 = vadd.f32 %v2221_v27, %v966_v36 }
 0x78d   :  { %v980_v39 = vpack.c.bf16 %v974_v38, %v973_v37  ;;  %v2233_v37 = vld [vmem:[%s3194_s1 + $0x9] ss:$0 sm:$0xff] }
 0x78f   :  { %2438 = vmatmul.mubr.msk.bf16.vlgmr.msra.gmra.mrb[16].mxu0 %vm194_vm1, %v980_v39 }
 0x862   :  { %v2439_v45 = vpop.f32.mrb[16].mxu0 }
 0x863   :  { %v1047_v46 = vadd.f32 %v2439_v45, %v2222_v44  ;;  %v1038_v47 = vpop.f32.mrb[17].mxu0 }
 0x864   :  { %v1039_v50 = vadd.f32 %v2222_v44, %v1038_v47  ;;  %v2440_v53 = vpop.f32.mrb[18].mxu0 }
 0x865   :  { %v1059_v55 = vmul.f32 0.044715, %v1047_v46  ;;  %v1050_v56 = vadd.f32 %v2440_v53, %v2222_v44  ;;  %v1041_v57 = vpop.f32.mrb[19].mxu0  ;;  %v1055_v24 = vmul.f32 0.5, %v1047_v46 }
 0x866   :  { %v1057_v58 = vmul.f32 0.044715, %v1039_v50  ;;  %v1042_v59 = vadd.f32 %v2222_v44, %v1041_v57  ;;  %v1053_v28 = vmul.f32 0.5, %v1039_v50 }
 0x867   :  { %v1063_v60 = vmul.f32 %v1059_v55, %v1047_v46  ;;  %v1060_v61 = vmul.f32 0.044715, %v1050_v56  ;;  %v1056_v25 = vmul.f32 0.5, %v1050_v56 }
 0x868   :  { %v1061_v62 = vmul.f32 %v1057_v58, %v1039_v50  ;;  %v1058_v63 = vmul.f32 0.044715, %v1042_v59  ;;  %v1054_v31 = vmul.f32 0.5, %v1042_v59 }
 0x869   :  { %v1067_v1 = vmul.f32 %v1063_v60, %v1047_v46  ;;  %v1064_v3 = vmul.f32 %v1060_v61, %v1050_v56 }
 0x86a   :  { %v1065_v4 = vmul.f32 %v1061_v62, %v1039_v50  ;;  %v1062_v5 = vmul.f32 %v1058_v63, %v1042_v59  ;;  %v2563_v62 = vld [vmem:[%s3195_s2 + $0x80] sm:$0xff]  }
 0x86b   :  { %v1071_v6 = vadd.f32 %v1067_v1, %v1047_v46  ;;  %v1068_v7 = vmul.f32 %v1064_v3, %v1050_v56  ;;  %v2564_v63 = vld [vmem:[%s3195_s2 + $0xa0] sm:$0xff]   ;;  %v2565_v1 = vld [vmem:[%s3195_s2 + $0x88] sm:$0xff]   ;;  %2453 = vmatprep.subr.bf16.mxu0 %v2563_v62 }
 0x86c   :  { %v1069_v8 = vadd.f32 %v1065_v4, %v1039_v50  ;;  %v1066_v9 = vmul.f32 %v1062_v5, %v1042_v59  ;;  %2469 = vmatprep.subr.bf16.mxu1 %v2564_v63  ;;  %2454 = vmatpush3.bf16.msra.mxu0 %v2563_v62  ;;  %v2566_v3 = vld [vmem:[%s3195_s2 + $0xa8] sm:$0xff]   ;;  %v3036_v4 = vld [vmem:[%s3195_s2 + $0x90] sm:$0xff]  }
 0x86d   :  { %v1075_v2 = vmul.f32 0.7978846, %v1071_v6  ;;  %v1072_v10 = vadd.f32 %v1068_v7, %v1050_v56  ;;  %2455 = vmatprep.subr.bf16.mxu0 %v2565_v1 }
 0x86e   :  { %v1073_v11 = vmul.f32 0.7978846, %v1069_v8  ;;  %v1070_v12 = vadd.f32 %v1066_v9, %v1042_v59 }
 0x86f   :  { %2611 = vtanh.f32 %v1075_v2  ;;  %v1076_v13 = vmul.f32 0.7978846, %v1072_v10 }
 0x870   :  { %2613 = vtanh.f32 %v1073_v11  ;;  %v1074_v16 = vmul.f32 0.7978846, %v1070_v12  ;;  %2456 = vmatpush3.bf16.msra.mxu0 %v2565_v1  ;;  %v2568_v1 = vld [vmem:[%s3195_s2 + $0x98] sm:$0xff]  }
 0x871   :  { %2615 = vtanh.f32 %v1076_v13  ;;  %2461 = vmatprep.subr.bf16.mxu0 %v3036_v4 }
 0x872   :  { %2617 = vtanh.f32 %v1074_v16 }
 0x879   :  { %v2612_v18 = vpop.eup %2611 }
 0x87a   :  { %v2614_v19 = vpop.eup %2613  ;;  %v1083_v20 = vadd.f32 1.0, %v2612_v18 }
 0x87b   :  { %v2616_v21 = vpop.eup %2615  ;;  %v1081_v22 = vadd.f32 1.0, %v2614_v19 }
 0x87c   :  { %v2618_v23 = vpop.eup %2617  ;;  %v1084_v27 = vadd.f32 1.0, %v2616_v21  ;;  %v1087_v0 = vmul.f32 %v1083_v20, %v1055_v24 }
 0x87d   :  { %v1082_v33 = vadd.f32 1.0, %v2618_v23  ;;  %v1085_v15 = vmul.f32 %v1081_v22, %v1053_v28 }
 0x87e   :  { %v1088_v32 = vmul.f32 %v1084_v27, %v1056_v25 }
 0x87f   :  { %v1086_v14 = vmul.f32 %v1082_v33, %v1054_v31 }
 0x880   :  { %v1090_v35 = vpack.c.bf16 %v1088_v32, %v1087_v0 }
 0x881   :  { %v1089_v17 = vpack.c.bf16 %v1086_v14, %v1085_v15 }
 0x883   :  { %2449 = vmatprep.mubr.msk.bf16.mxu1 %vm25_vm0, %v1089_v17 }
 0x884   :  { %2450 = vmatmul.mubr.msk.bf16.vlgmr.msra.gmra.mrb[20].mxu1 %vm25_vm0, %v1090_v35 }
 0x885   :  { %2470 = vmatpush3.bf16.msra.mxu1 %v2564_v63 }
 0x886   :  { %2471 = vmatprep.subr.bf16.mxu1 %v2566_v3 }
 0x889   :  { %2472 = vmatpush3.bf16.msra.mxu1 %v2566_v3 }
 0x88a   :  { %2483 = vmatprep.subr.bf16.mxu1 %v2667_v48 }
 0x957   :  { %v2451_v36 = vpop.f32.mrb[20].mxu1 }
 0x958   :  { %v1172_v38 = vadd.f32 %v2451_v36, %v2920_v26  ;;  %v1155_v39 = vpop.f32.mrb[21].mxu1 }
 0x959   :  { %v1170_v40 = vadd.f32 %v1155_v39, %v2923_v29  ;;  %v2452_v41 = vpop.f32.mrb[22].mxu1 }
 0x95a   :  { %v2991_v42 = vadd.f32 %v2233_v37, %v1172_v38  ;;  %v1173_v43 = vadd.f32 %v2452_v41, %v2926_v30  ;;  %v1158_v44 = vpop.f32.mrb[23].mxu1 }
 0x95b   :  { %v1171_v45 = vadd.f32 %v1158_v44, %v2931_v34  ;;  %v2995_v46 = vadd.f32 %v2233_v37, %v1170_v40 }
 0x95c   :  { %v2997_v47 = vadd.f32 %v2233_v37, %v1173_v43  ;;  %v1191_v50 = vsel %vm194_vm1, %v2991_v42, 0.0  ;;  %v1203_v57 = vmul.f32 %v2991_v42, %v2991_v42 }
 0x95d   :  { %1192 = vadd.xlane.f32.xlu0 %v1191_v50  ;;  %v3001_v26 = vadd.f32 %v2233_v37, %v1171_v45  ;;  %v1185_v30 = vsel %vm194_vm1, %v2995_v46, 0.0  ;;  %v1201_v34 = vmul.f32 %v2995_v46, %v2995_v46  ;;  %v2234_v37 = vld [vmem:[%s3194_s1 + $0xa] ss:$0 sm:$0xff]  ;;  %v2235_v50 = vld [vmem:[%s3194_s1 + $0xb] ss:$0 sm:$0xff] }
 0x95e   :  { %v1194_v29 = vsel %vm194_vm1, %v2997_v47, 0.0  ;;  %v1204_v59 = vmul.f32 %v2997_v47, %v2997_v47  ;;  %v1211_v60 = vsel %vm194_vm1, %v1203_v57, 0.0 }
 0x95f   :  { %1195 = vadd.xlane.f32.xlu1 %v1194_v29  ;;  %v1188_v53 = vsel %vm194_vm1, %v3001_v26, 0.0  ;;  %v1202_v55 = vmul.f32 %v3001_v26, %v3001_v26  ;;  %v1205_v56 = vsel %vm194_vm1, %v1201_v34, 0.0 }
 0x960   :  { %v1214_v61 = vsel %vm194_vm1, %v1204_v59, 0.0 }
 0x961   :  { %1186 = vadd.xlane.f32.xlu0 %v1185_v30  ;;  %v1208_v58 = vsel %vm194_vm1, %v1202_v55, 0.0 }
 0x963   :  { %1189 = vadd.xlane.f32.xlu1 %v1188_v53 }
 0x965   :  { %1206 = vadd.xlane.f32.xlu0 %v1205_v56 }
 0x967   :  { %1209 = vadd.xlane.f32.xlu1 %v1208_v58 }
 0x969   :  { %1212 = vadd.xlane.f32.xlu0 %v1211_v60 }
 0x96b   :  { %1215 = vadd.xlane.f32.xlu1 %v1214_v61 }
 0x9ea   :  { %v1193_v5 = vpop.xlane.xlu0 %1192 }
 0x9eb   :  { %v1199_v11 = vmul.f32 0.03125, %v1193_v5 }
 0x9ec   :  { %v1196_v6 = vpop.xlane.xlu1 %1195 }
 0x9ed   :  { %v1200_v16 = vmul.f32 0.03125, %v1196_v6  ;;  %v1223_v23 = vmul.f32 %v1199_v11, %v1199_v11  ;;  %v1239_v41 = vsub.f32 %v2991_v42, %v1199_v11 }
 0x9ee   :  { %v1187_v7 = vpop.xlane.xlu0 %1186 }
 0x9ef   :  { %v1197_v8 = vmul.f32 0.03125, %v1187_v7  ;;  %v1224_v28 = vmul.f32 %v1200_v16, %v1200_v16  ;;  %v1240_v29 = vsub.f32 %v2997_v47, %v1200_v16 }
 0x9f0   :  { %v1190_v9 = vpop.xlane.xlu1 %1189 }
 0x9f1   :  { %v1198_v2 = vmul.f32 0.03125, %v1190_v9  ;;  %v1221_v12 = vmul.f32 %v1197_v8, %v1197_v8  ;;  %v1237_v17 = vsub.f32 %v2995_v46, %v1197_v8 }
 0x9f2   :  { %v1207_v10 = vpop.xlane.xlu0 %1206 }
 0x9f3   :  { %v1217_v13 = vmul.f32 0.03125, %v1207_v10  ;;  %v1222_v19 = vmul.f32 %v1198_v2, %v1198_v2  ;;  %v1238_v38 = vsub.f32 %v3001_v26, %v1198_v2 }
 0x9f4   :  { %v1210_v18 = vpop.xlane.xlu1 %1209 }
 0x9f5   :  { %v1225_v20 = vsub.f32 %v1217_v13, %v1221_v12  ;;  %v1218_v21 = vmul.f32 0.03125, %v1210_v18 }
 0x9f6   :  { %v1213_v22 = vpop.xlane.xlu0 %1212 }
 0x9f7   :  { %v1229_v24 = vadd.f32 1e-05, %v1225_v20  ;;  %v1226_v25 = vsub.f32 %v1218_v21, %v1222_v19  ;;  %v1219_v27 = vmul.f32 0.03125, %v1213_v22 }
 0x9f8   :  { %v1216_v31 = vpop.xlane.xlu1 %1215 }
 0x9f9   :  { %2619 = vrsqrt.f32 %v1229_v24  ;;  %v1230_v33 = vadd.f32 1e-05, %v1226_v25  ;;  %v1227_v0 = vsub.f32 %v1219_v27, %v1223_v23  ;;  %v1220_v32 = vmul.f32 0.03125, %v1216_v31 }
 0x9fb   :  { %2621 = vrsqrt.f32 %v1230_v33  ;;  %v1231_v15 = vadd.f32 1e-05, %v1227_v0  ;;  %v1228_v14 = vsub.f32 %v1220_v32, %v1224_v28 }
 0x9fd   :  { %2623 = vrsqrt.f32 %v1231_v15  ;;  %v1232_v35 = vadd.f32 1e-05, %v1228_v14 }
 0x9ff   :  { %2625 = vrsqrt.f32 %v1232_v35 }
 0xa03   :  { %v2620_v36 = vpop.eup %2619 }
 0xa04   :  { %v1241_v39 = vmul.f32 %v2620_v36, %v1237_v17 }
 0xa05   :  { %v2622_v40 = vpop.eup %2621 }
 0xa06   :  { %v1242_v43 = vmul.f32 %v2622_v40, %v1238_v38  ;;  %v1249_v44 = vmul.f32 %v2234_v37, %v1241_v39 }
 0xa07   :  { %v2624_v45 = vpop.eup %2623 }
 0xa08   :  { %v1243_v30 = vmul.f32 %v2624_v45, %v1239_v41  ;;  %v1250_v34 = vmul.f32 %v2234_v37, %v1242_v43  ;;  %v1257_v56 = vadd.f32 %v2235_v50, %v1249_v44 }
 0xa09   :  { %v2626_v53 = vpop.eup %2625 }
 0xa0a   :  { %v1244_v55 = vmul.f32 %v2626_v53, %v1240_v29  ;;  %v1258_v57 = vadd.f32 %v2235_v50, %v1250_v34  ;;  %v1251_v58 = vmul.f32 %v2234_v37, %v1243_v30 }
 0xa0c   :  { %v1261_v59 = vpack.c.bf16 %v1258_v57, %v1257_v56  ;;  %v1252_v60 = vmul.f32 %v2234_v37, %v1244_v55  ;;  %v1259_v61 = vadd.f32 %v2235_v50, %v1251_v58 }
 0xa0e   :  { %2457 = vmatprep.mubr.msk.bf16.mxu0 %vm194_vm1, %v1261_v59  ;;  %2473 = vmatprep.mubr.msk.bf16.mxu1 %vm194_vm1, %v1261_v59  ;;  %v1260_v62 = vadd.f32 %v2235_v50, %v1252_v60 }
 0xa10   :  { %v1262_v63 = vpack.c.bf16 %v1260_v62, %v1259_v61 }
 0xa12   :  { %2458 = vmatmul.mubr.msk.bf16.vlgmr.msra.gmra.mrb[20].mxu0 %vm194_vm1, %v1262_v63  ;;  %2474 = vmatmul.mubr.msk.bf16.vlgmr.msra.gmra.mrb[24].mxu1 %vm194_vm1, %v1262_v63 }
 0xa13   :  { %2462 = vmatpush3.bf16.msra.mxu0 %v3036_v4  ;;  %2465 = vmatprep.mubr.msk.bf16.mxu0 %vm194_vm1, %v1261_v59 }
 0xa14   :  { %2463 = vmatprep.subr.bf16.mxu0 %v2568_v1  ;;  %2487 = vmatprep.mubr.msk.bf16.mxu1 %vm2668_vm3, %v2667_v48 }
 0xa17   :  { %2464 = vmatpush3.bf16.msra.mxu0 %v2568_v1 }
 0xa1a   :  { %2466 = vmatmul.mubr.msk.bf16.vlgmr.msra.gmra.mrb[24].mxu0 %vm194_vm1, %v1262_v63 }
 0xae5   :  { %v2459_v3 = vpop.f32.mrb[20].mxu0  ;;  %v2475_v5 = vpop.f32.mrb[24].mxu1 }
 0xae6   :  { %v1339_v6 = vpop.f32.mrb[21].mxu0  ;;  %v1461_v7 = vpop.f32.mrb[25].mxu1 }
 0xae7   :  { %v2460_v8 = vpop.f32.mrb[22].mxu0  ;;  %v2476_v9 = vpop.f32.mrb[26].mxu1 }
 0xae8   :  { %v1679_v2 = vpack.c.bf16 %v2460_v8, %v2459_v3  ;;  %v1601_v10 = vpack.c.bf16 %v2476_v9, %v2475_v5  ;;  %v1342_v11 = vpop.f32.mrb[23].mxu0  ;;  %v1464_v12 = vpop.f32.mrb[27].mxu1 }
 0xae9   :  { %v1555_v4 = vpack.c.bf16 %v1342_v11, %v1339_v6  ;;  %v1477_v13 = vpack.c.bf16 %v1464_v12, %v1461_v7 }
 0xaeb   :  { %2477 = vmatprep.subr.bf16.mxu0 %v1477_v13 }
 0xaec   :  { %2478 = vmatpush3.bf16.msra.mxu0 %v1477_v13  ;;  %v2571_v13 = vld [vmem:[%s3196_s3 + $0x10] sm:$0xff]  }
 0xaed   :  { %v2467_v16 = vpop.f32.mrb[24].mxu0  ;;  %2491 = vmatprep.subr.bf16.mxu0 %v1601_v10 }
 0xaee   :  { %v1400_v18 = vpop.f32.mrb[25].mxu0 }
 0xaef   :  { %v2468_v19 = vpop.f32.mrb[26].mxu0 }
 0xaf0   :  { %v1600_v20 = vpack.c.bf16 %v2468_v19, %v2467_v16  ;;  %v1403_v21 = vpop.f32.mrb[27].mxu0  ;;  %v2572_v16 = vld [vmem:[%s3196_s3 + $0x18] sm:$0xff]  }
 0xaf1   :  { %v1476_v22 = vpack.c.bf16 %v1403_v21, %v1400_v18 }
 0xaf2   :  { %1602 = vxpose.xlu1.c.b16.start.end [1/1] (short) (narrow) %v1600_v20, 32 }
 0xaf3   :  { %1478 = vxpose.xlu0.c.b16.start.end [1/1] (short) (narrow) %v1476_v22, 32 }
 0xb58   :  { %v1610_v24 = vpop.trf.xlu1 }
 0xb59   :  { %v1486_v23 = vpop.trf.xlu0 }
 0xb5a   :  { %2479 = vmatprep.mubr.msk.bf16.mxu0 %vm593_vm2, %v1486_v23 }
 0xb5c   :  { %v1611_v27 = vpop.trf.xlu1 }
 0xb5d   :  { %v1487_v25 = vpop.trf.xlu0 }
 0xb5e   :  { %2480 = vmatmul.mubr.msk.bf16.vlgmr.msra.gmra.mrb[28].mxu0 %vm593_vm2, %v1487_v25 }
 0xb5f   :  { %2492 = vmatpush3.bf16.msra.mxu0 %v1601_v10  ;;  %2493 = vmatprep.mubr.msk.bf16.mxu0 %vm593_vm2, %v1610_v24 }
 0xb66   :  { %2494 = vmatmul.mubr.msk.bf16.vlgmr.msra.gmra.mrb[32].mxu0 %vm593_vm2, %v1611_v27 }
 0xc31   :  { %v2481_v28 = vpop.f32.mrb[28].mxu0 }
 0xc32   :  { %v1534_v31 = vpop.f32.mrb[29].mxu0  ;;  %v1551_v0 = vmul.f32 %v2481_v28, %v2876_v49 }
 0xc33   :  { %v2482_v33 = vpop.f32.mrb[30].mxu0  ;;  %v1549_v14 = vmul.f32 %v1534_v31, %v2886_v52 }
 0xc34   :  { %v1552_v32 = vmul.f32 %v2482_v33, %v2881_v51  ;;  %v1537_v15 = vpop.f32.mrb[31].mxu0 }
 0xc35   :  { %v1550_v35 = vmul.f32 %v1537_v15, %v2891_v54 }
 0xc36   :  { %v1554_v17 = vpack.c.bf16 %v1552_v32, %v1551_v0 }
 0xc37   :  { %v1553_v36 = vpack.c.bf16 %v1550_v35, %v1549_v14 }
 0xc39   :  { %2484 = vmatpush3.bf16.msra.mxu1 %v1553_v36  ;;  %v2495_v37 = vpop.f32.mrb[32].mxu0 }
 0xc3a   :  { %v1658_v38 = vpop.f32.mrb[33].mxu0  ;;  %2485 = vmatprep.subr.bf16.mxu1 %v2667_v48  ;;  %v1675_v40 = vmul.f32 %v2495_v37, %v2876_v49  ;;  %v2569_v49 = vld [vmem:[%s3195_s2 + $0xb0] sm:$0xff]  }
 0xc3b   :  { %v2496_v39 = vpop.f32.mrb[34].mxu0  ;;  %v1673_v44 = vmul.f32 %v1658_v38, %v2886_v52  ;;  %2505 = vmatprep.subr.bf16.mxu0 %v2569_v49 }
 0xc3c   :  { %v1676_v41 = vmul.f32 %v2496_v39, %v2881_v51  ;;  %v1661_v43 = vpop.f32.mrb[35].mxu0  ;;  %2506 = vmatpush3.bf16.msra.mxu0 %v2569_v49  ;;  %v2570_v51 = vld [vmem:[%s3195_s2 + $0xb8] sm:$0xff]  }
 0xc3d   :  { %v1674_v45 = vmul.f32 %v1661_v43, %v2891_v54  ;;  %2486 = vmatpush3.bf16.msra.mxu1 %v1554_v17  ;;  %2507 = vmatprep.subr.bf16.mxu0 %v2570_v51 }
 0xc3e   :  { %v1678_v50 = vpack.c.bf16 %v1676_v41, %v1675_v40  ;;  %2497 = vmatprep.subr.bf16.mxu1 %v2667_v48 }
 0xc3f   :  { %v1677_v29 = vpack.c.bf16 %v1674_v45, %v1673_v44 }
 0xc40   :  { %2488 = vmatmul.mubr.msk.bf16.vlgmr.msra.gmra.mrb[28].mxu1 %vm194_vm1, %v1555_v4  ;;  %2508 = vmatpush3.bf16.msra.mxu0 %v2570_v51  ;;  %v2258_v51 = vld [vmem:[%s3194_s1 + $0xc] ss:$0 sm:$0xff] }
 0xc41   :  { %2498 = vmatpush3.bf16.msra.mxu1 %v1677_v29  ;;  %2501 = vmatprep.mubr.msk.bf16.mxu1 %vm2668_vm3, %v2667_v48 }
 0xc42   :  { %2499 = vmatprep.subr.bf16.mxu1 %v2667_v48 }
 0xc45   :  { %2500 = vmatpush3.bf16.msra.mxu1 %v1678_v50 }
 0xc46   :  { %2513 = vmatprep.subr.bf16.mxu1 %v2571_v13 }
 0xc48   :  { %2502 = vmatmul.mubr.msk.bf16.vlgmr.msra.gmra.mrb[32].mxu1 %vm194_vm1, %v1679_v2 }
 0xc49   :  { %2514 = vmatpush3.bf16.msra.mxu1 %v2571_v13 }
 0xc4a   :  { %2515 = vmatprep.subr.bf16.mxu1 %v2572_v16 }
 0xc4d   :  { %2516 = vmatpush3.bf16.msra.mxu1 %v2572_v16 }
 0xc4e   :  { %2533 = vmatprep.subr.bf16.mxu1 %v2667_v48 }
 0xd13   :  { %v1593_v52 = vpop.f32.mrb[28].mxu1 }
 0xd14   :  { %v2489_v54 = vpop.f32.mrb[29].mxu1 }
 0xd15   :  { %v1596_v30 = vpop.f32.mrb[30].mxu1 }
 0xd16   :  { %v1724_v34 = vpack.c.bf16 %v1596_v30, %v1593_v52  ;;  %v2490_v53 = vpop.f32.mrb[31].mxu1 }
 0xd18   :  { %2509 = vmatprep.mubr.msk.bf16.mxu0 %vm194_vm1, %v1724_v34 }
 0xd1b   :  { %v1717_v55 = vpop.f32.mrb[32].mxu1 }
 0xd1c   :  { %v2503_v56 = vpop.f32.mrb[33].mxu1 }
 0xd1d   :  { %v1720_v57 = vpop.f32.mrb[34].mxu1 }
 0xd1e   :  { %v1725_v58 = vpack.c.bf16 %v1720_v57, %v1717_v55  ;;  %v2504_v59 = vpop.f32.mrb[35].mxu1  ;;  %v2259_v57 = vld [vmem:[%s3194_s1 + $0xd] ss:$0 sm:$0xff] }
 0xd20   :  { %2510 = vmatmul.mubr.msk.bf16.vlgmr.msra.gmra.mrb[36].mxu0 %vm194_vm1, %v1725_v58 }
 0xdf3   :  { %v2511_v60 = vpop.f32.mrb[36].mxu0 }
 0xdf4   :  { %v3090_v61 = vadd.f32 %v2511_v60, %v2991_v42  ;;  %v1778_v62 = vpop.f32.mrb[37].mxu0 }
 0xdf5   :  { %v2512_v63 = vpop.f32.mrb[38].mxu0  ;;  %v3093_v1 = vadd.f32 %v1778_v62, %v2995_v46 }
 0xdf6   :  { %v3096_v3 = vadd.f32 %v2512_v63, %v2997_v47  ;;  %v1781_v5 = vpop.f32.mrb[39].mxu0  ;;  %v1805_v6 = vsel %vm194_vm1, %v3090_v61, 0.0  ;;  %v1817_v2 = vmul.f32 %v3090_v61, %v3090_v61 }
 0xdf7   :  { %1806 = vadd.xlane.f32.xlu0 %v1805_v6  ;;  %v3101_v7 = vadd.f32 %v1781_v5, %v3001_v26  ;;  %v1799_v8 = vsel %vm194_vm1, %v3093_v1, 0.0  ;;  %v1815_v46 = vmul.f32 %v3093_v1, %v3093_v1 }
 0xdf8   :  { %v1808_v42 = vsel %vm194_vm1, %v3096_v3, 0.0  ;;  %v1818_v11 = vmul.f32 %v3096_v3, %v3096_v3  ;;  %v1825_v12 = vsel %vm194_vm1, %v1817_v2, 0.0  ;;  %v2573_v2 = vld [vmem:[%s3195_s2 + $0xc0] sm:$0xff]  }
 0xdf9   :  { %1809 = vadd.xlane.f32.xlu1 %v1808_v42  ;;  %v1802_v47 = vsel %vm194_vm1, %v3101_v7, 0.0  ;;  %v1816_v9 = vmul.f32 %v3101_v7, %v3101_v7  ;;  %v1819_v26 = vsel %vm194_vm1, %v1815_v46, 0.0  ;;  %2521 = vmatprep.subr.bf16.mxu0 %v2573_v2 }
 0xdfa   :  { %v1828_v4 = vsel %vm194_vm1, %v1818_v11, 0.0  ;;  %2522 = vmatpush3.bf16.msra.mxu0 %v2573_v2  ;;  %v2575_v11 = vld [vmem:[%s3195_s2 + $0xd0] sm:$0xff]  }
 0xdfb   :  { %1800 = vadd.xlane.f32.xlu0 %v1799_v8  ;;  %v1822_v10 = vsel %vm194_vm1, %v1816_v9, 0.0 }
 0xdfd   :  { %1803 = vadd.xlane.f32.xlu1 %v1802_v47 }
 0xdff   :  { %1820 = vadd.xlane.f32.xlu0 %v1819_v26 }
 0xe01   :  { %1823 = vadd.xlane.f32.xlu1 %v1822_v10  ;;  %v2574_v10 = vld [vmem:[%s3195_s2 + $0xc8] sm:$0xff]  }
 0xe02   :  { %2523 = vmatprep.subr.bf16.mxu0 %v2574_v10 }
 0xe03   :  { %1826 = vadd.xlane.f32.xlu0 %v1825_v12  ;;  %2524 = vmatpush3.bf16.msra.mxu0 %v2574_v10  ;;  %v2576_v12 = vld [vmem:[%s3195_s2 + $0xd8] sm:$0xff]  }
 0xe04   :  { %2525 = vmatprep.subr.bf16.mxu0 %v2575_v11 }
 0xe05   :  { %1829 = vadd.xlane.f32.xlu1 %v1828_v4  ;;  %v2260_v4 = vld [vmem:[%s3194_s1 + $0xe] ss:$0 sm:$0xff] }
 0xe07   :  { %2526 = vmatpush3.bf16.msra.mxu0 %v2575_v11 }
 0xe08   :  { %2527 = vmatprep.subr.bf16.mxu0 %v2576_v12 }
 0xe0b   :  { %2528 = vmatpush3.bf16.msra.mxu0 %v2576_v12 }
 0xe84   :  { %v1807_v18 = vpop.xlane.xlu0 %1806 }
 0xe85   :  { %v1813_v25 = vmul.f32 0.03125, %v1807_v18 }
 0xe86   :  { %v1810_v19 = vpop.xlane.xlu1 %1809 }
 0xe87   :  { %v1814_v31 = vmul.f32 0.03125, %v1810_v19  ;;  %v1837_v35 = vmul.f32 %v1813_v25, %v1813_v25  ;;  %v1853_v34 = vsub.f32 %v3090_v61, %v1813_v25 }
 0xe88   :  { %v1801_v20 = vpop.xlane.xlu0 %1800 }
 0xe89   :  { %v1811_v21 = vmul.f32 0.03125, %v1801_v20  ;;  %v1838_v38 = vmul.f32 %v1814_v31, %v1814_v31  ;;  %v1854_v58 = vsub.f32 %v3096_v3, %v1814_v31 }
 0xe8a   :  { %v1804_v22 = vpop.xlane.xlu1 %1803 }
 0xe8b   :  { %v1812_v23 = vmul.f32 0.03125, %v1804_v22  ;;  %v1835_v27 = vmul.f32 %v1811_v21, %v1811_v21  ;;  %v1851_v29 = vsub.f32 %v3093_v1, %v1811_v21 }
 0xe8c   :  { %v1821_v24 = vpop.xlane.xlu0 %1820 }
 0xe8d   :  { %v1831_v28 = vmul.f32 0.03125, %v1821_v24  ;;  %v1836_v0 = vmul.f32 %v1812_v23, %v1812_v23  ;;  %v1852_v52 = vsub.f32 %v3101_v7, %v1812_v23 }
 0xe8e   :  { %v1824_v33 = vpop.xlane.xlu1 %1823 }
 0xe8f   :  { %v1839_v32 = vsub.f32 %v1831_v28, %v1835_v27  ;;  %v1832_v15 = vmul.f32 0.03125, %v1824_v33 }
 0xe90   :  { %v1827_v14 = vpop.xlane.xlu0 %1826 }
 0xe91   :  { %v1843_v17 = vadd.f32 1e-05, %v1839_v32  ;;  %v1840_v36 = vsub.f32 %v1832_v15, %v1836_v0  ;;  %v1833_v37 = vmul.f32 0.03125, %v1827_v14 }
 0xe92   :  { %v1830_v39 = vpop.xlane.xlu1 %1829 }
 0xe93   :  { %2627 = vrsqrt.f32 %v1843_v17  ;;  %v1844_v40 = vadd.f32 1e-05, %v1840_v36  ;;  %v1841_v41 = vsub.f32 %v1833_v37, %v1837_v35  ;;  %v1834_v43 = vmul.f32 0.03125, %v1830_v39 }
 0xe95   :  { %2629 = vrsqrt.f32 %v1844_v40  ;;  %v1845_v44 = vadd.f32 1e-05, %v1841_v41  ;;  %v1842_v45 = vsub.f32 %v1834_v43, %v1838_v38 }
 0xe97   :  { %2631 = vrsqrt.f32 %v1845_v44  ;;  %v1846_v50 = vadd.f32 1e-05, %v1842_v45 }
 0xe99   :  { %2633 = vrsqrt.f32 %v1846_v50 }
 0xe9d   :  { %v2628_v49 = vpop.eup %2627 }
 0xe9e   :  { %v1855_v54 = vmul.f32 %v2628_v49, %v1851_v29 }
 0xe9f   :  { %v2630_v30 = vpop.eup %2629 }
 0xea0   :  { %v1856_v53 = vmul.f32 %v2630_v30, %v1852_v52  ;;  %v1863_v55 = vmul.f32 %v2258_v51, %v1855_v54 }
 0xea1   :  { %v2632_v56 = vpop.eup %2631 }
 0xea2   :  { %v1857_v59 = vmul.f32 %v2632_v56, %v1853_v34  ;;  %v1864_v60 = vmul.f32 %v2258_v51, %v1856_v53  ;;  %v1871_v5 = vadd.f32 %v2259_v57, %v1863_v55 }
 0xea3   :  { %v2634_v62 = vpop.eup %2633 }
 0xea4   :  { %v1858_v63 = vmul.f32 %v2634_v62, %v1854_v58  ;;  %v1872_v6 = vadd.f32 %v2259_v57, %v1864_v60  ;;  %v1865_v42 = vmul.f32 %v2258_v51, %v1857_v59 }
 0xea6   :  { %v1879_v8 = vpack.c.bf16 %v1872_v6, %v1871_v5  ;;  %v1866_v46 = vmul.f32 %v2258_v51, %v1858_v63  ;;  %v1873_v47 = vadd.f32 %v2259_v57, %v1865_v42  ;;  %v2577_v5 = vld [vmem:[%s3196_s3 + $0x20] sm:$0xff]   ;;  %v2578_v6 = vld [vmem:[%s3196_s3 + $0x28] sm:$0xff]  }
 0xea8   :  { %2517 = vmatprep.mubr.msk.bf16.mxu1 %vm194_vm1, %v1879_v8  ;;  %v1874_v9 = vadd.f32 %v2259_v57, %v1866_v46  ;;  %v2271_v8 = vld [vmem:[%s3194_s1 + $0xf] ss:$0 sm:$0xff] }
 0xeaa   :  { %v1880_v26 = vpack.c.bf16 %v1874_v9, %v1873_v47 }
 0xeac   :  { %2518 = vmatmul.mubr.msk.bf16.vlgmr.msra.gmra.mrb[36].mxu1 %vm194_vm1, %v1880_v26 }
 0xead   :  { %2537 = vmatprep.mubr.msk.bf16.mxu1 %vm2668_vm3, %v2667_v48  ;;  %2534 = vmatpush3.bf16.msra.mxu1 %v2577_v5 }
 0xeae   :  { %2535 = vmatprep.subr.bf16.mxu1 %v2667_v48 }
 0xeb1   :  { %2536 = vmatpush3.bf16.msra.mxu1 %v2578_v6 }
 0xf7f   :  { %v2519_v13 = vpop.f32.mrb[36].mxu1 }
 0xf80   :  { %v1947_v16 = vadd.f32 %v2519_v13, %v2260_v4  ;;  %v1938_v18 = vpop.f32.mrb[37].mxu1 }
 0xf81   :  { %v1939_v19 = vadd.f32 %v2260_v4, %v1938_v18  ;;  %v2520_v20 = vpop.f32.mrb[38].mxu1 }
 0xf82   :  { %v1959_v21 = vmul.f32 0.044715, %v1947_v16  ;;  %v1950_v22 = vadd.f32 %v2520_v20, %v2260_v4  ;;  %v1941_v23 = vpop.f32.mrb[39].mxu1  ;;  %v1955_v54 = vmul.f32 0.5, %v1947_v16 }
 0xf83   :  { %v1957_v24 = vmul.f32 0.044715, %v1939_v19  ;;  %v1942_v25 = vadd.f32 %v2260_v4, %v1941_v23  ;;  %v1953_v53 = vmul.f32 0.5, %v1939_v19 }
 0xf84   :  { %v1963_v27 = vmul.f32 %v1959_v21, %v1947_v16  ;;  %v1960_v28 = vmul.f32 0.044715, %v1950_v22  ;;  %v1956_v30 = vmul.f32 0.5, %v1950_v22 }
 0xf85   :  { %v1961_v31 = vmul.f32 %v1957_v24, %v1939_v19  ;;  %v1958_v33 = vmul.f32 0.044715, %v1942_v25  ;;  %v1954_v55 = vmul.f32 0.5, %v1942_v25 }
 0xf86   :  { %v1967_v0 = vmul.f32 %v1963_v27, %v1947_v16  ;;  %v1964_v32 = vmul.f32 %v1960_v28, %v1950_v22 }
 0xf87   :  { %v1965_v15 = vmul.f32 %v1961_v31, %v1939_v19  ;;  %v1962_v14 = vmul.f32 %v1958_v33, %v1942_v25 }
 0xf88   :  { %v1971_v35 = vadd.f32 %v1967_v0, %v1947_v16  ;;  %v1968_v17 = vmul.f32 %v1964_v32, %v1950_v22 }
 0xf89   :  { %v1969_v36 = vadd.f32 %v1965_v15, %v1939_v19  ;;  %v1966_v37 = vmul.f32 %v1962_v14, %v1942_v25 }
 0xf8a   :  { %v1975_v38 = vmul.f32 0.7978846, %v1971_v35  ;;  %v1972_v39 = vadd.f32 %v1968_v17, %v1950_v22  ;;  %v2272_v17 = vld [vmem:[%s3194_s1 + $0x10] ss:$0 sm:$0xff] }
 0xf8b   :  { %v1973_v40 = vmul.f32 0.7978846, %v1969_v36  ;;  %v1970_v41 = vadd.f32 %v1966_v37, %v1942_v25 }
 0xf8c   :  { %2635 = vtanh.f32 %v1975_v38  ;;  %v1976_v43 = vmul.f32 0.7978846, %v1972_v39 }
 0xf8d   :  { %2637 = vtanh.f32 %v1973_v40  ;;  %v1974_v44 = vmul.f32 0.7978846, %v1970_v41 }
 0xf8e   :  { %2639 = vtanh.f32 %v1976_v43 }
 0xf8f   :  { %2641 = vtanh.f32 %v1974_v44 }
 0xf96   :  { %v2636_v45 = vpop.eup %2635 }
 0xf97   :  { %v2638_v50 = vpop.eup %2637  ;;  %v1983_v29 = vadd.f32 1.0, %v2636_v45 }
 0xf98   :  { %v2640_v49 = vpop.eup %2639  ;;  %v1981_v51 = vadd.f32 1.0, %v2638_v50 }
 0xf99   :  { %v2642_v52 = vpop.eup %2641  ;;  %v1984_v34 = vadd.f32 1.0, %v2640_v49  ;;  %v1987_v57 = vmul.f32 %v1983_v29, %v1955_v54 }
 0xf9a   :  { %v1982_v56 = vadd.f32 1.0, %v2642_v52  ;;  %v1985_v59 = vmul.f32 %v1981_v51, %v1953_v53 }
 0xf9b   :  { %v1988_v58 = vmul.f32 %v1984_v34, %v1956_v30 }
 0xf9c   :  { %v1986_v60 = vmul.f32 %v1982_v56, %v1954_v55 }
 0xf9d   :  { %v1990_v62 = vpack.c.bf16 %v1988_v58, %v1987_v57 }
 0xf9e   :  { %v1989_v63 = vpack.c.bf16 %v1986_v60, %v1985_v59 }
 0xfa0   :  { %2529 = vmatprep.mubr.msk.bf16.mxu0 %vm25_vm0, %v1989_v63 }
 0xfa1   :  { %2530 = vmatmul.mubr.msk.bf16.vlgmr.msra.gmra.mrb[40].mxu0 %vm25_vm0, %v1990_v62 }
0x1074   :  { %v2531_v42 = vpop.f32.mrb[40].mxu0 }
0x1075   :  { %v2072_v46 = vadd.f32 %v2531_v42, %v3090_v61  ;;  %v2055_v47 = vpop.f32.mrb[41].mxu0 }
0x1076   :  { %v2070_v9 = vadd.f32 %v2055_v47, %v3093_v1  ;;  %v2532_v26 = vpop.f32.mrb[42].mxu0 }
0x1077   :  { %v2081_v2 = vadd.f32 %v2271_v8, %v2072_v46  ;;  %v2073_v10 = vadd.f32 %v2532_v26, %v3096_v3  ;;  %v2058_v48 = vpop.f32.mrb[43].mxu0 }
0x1078   :  { %v2079_v11 = vadd.f32 %v2271_v8, %v2070_v9  ;;  %v2071_v12 = vadd.f32 %v2058_v48, %v3101_v7 }
0x1079   :  { %v2082_v4 = vadd.f32 %v2271_v8, %v2073_v10  ;;  %v2094_v16 = vsel %vm194_vm1, %v2081_v2, 0.0 }
0x107a   :  { %v2080_v13 = vadd.f32 %v2271_v8, %v2071_v12  ;;  %v2083_v19 = vsel %vm194_vm1, %v2079_v11, 0.0 }
0x107b   :  { %v2095_v18 = vsel %vm194_vm1, %v2082_v4, 0.0 }
0x107c   :  { %v2096_v61 = vadd.f32 %v2095_v18, %v2094_v16  ;;  %v2084_v20 = vsel %vm194_vm1, %v2080_v13, 0.0 }
0x107d   :  { %v2085_v1 = vadd.f32 %v2084_v20, %v2083_v19 }
0x107e   :  { %v2097_v21 = vrot.slane %v2096_v61, 4 }
0x107f   :  { %v2086_v22 = vrot.slane %v2085_v1, 4 }
0x1080   :  { %v2098_v23 = vadd.f32 %v2097_v21, %v2096_v61 }
0x1081   :  { %v2087_v3 = vadd.f32 %v2086_v22, %v2085_v1 }
0x1082   :  { %v2099_v24 = vrot.slane %v2098_v23, 2 }
0x1083   :  { %v2088_v25 = vrot.slane %v2087_v3, 2 }
0x1084   :  { %v2100_v27 = vadd.f32 %v2099_v24, %v2098_v23 }
0x1085   :  { %v2089_v7 = vadd.f32 %v2088_v25, %v2087_v3 }
0x1086   :  { %v2101_v28 = vrot.slane %v2100_v27, 1 }
0x1087   :  { %v2090_v31 = vrot.slane %v2089_v7, 1 }
0x1088   :  { %v2102_v33 = vadd.f32 %v2101_v28, %v2100_v27 }
0x1089   :  { %v2091_v0 = vadd.f32 %v2090_v31, %v2089_v7 }
0x108a   :  { %v2103_v32 = vmul.f32 0.0625, %v2102_v33 }
0x108b   :  { %v2093_v15 = vmul.f32 0.0625, %v2091_v0 }
0x108d   :  { %v2105_v14 = vsel %vm2104_vm4, %v2093_v15, %v2103_v32 }
0x108e   :  { %v2110_v35 = vpack.c.bf16 %v2105_v14, %v2105_v14 }
0x1090   :  { %2538 = vmatmul.mubr.msk.bf16.vlgmr.msra.gmra.mrb[40].mxu1 %vm194_vm1, %v2110_v35 }
0x1163   :  { %v2165_v36 = vpop.f32.mrb[40].mxu1 }
0x1164   :  { %v2166_v37 = vadd.f32 %v2272_v17, %v2165_v36  ;;  %v2539_v38 = vpop.f32.mrb[41].mxu1 }
0x1165   :  { %v2168_v39 = vpop.f32.mrb[42].mxu1 }
0x1166   :  { %2171 = vst [vmem:[#allocation2] sm:$0x3] %v2166_v37  ;;  %v2540_v40 = vpop.f32.mrb[43].mxu1 }
0x1167   :  { %2654 = shalt.err (!%p2651_p4)
}
0x1168   :  { %s2655_s1 = scalar_lea.hbm %s3197_s4, 32 }
0x1169   :  { %p2656_p5 = scmp.ne.s32.totalorder %s3197_s4, %s2655_s1  ;;  %p2659_p6 = scmp.lt.u32.totalorder %s2655_s1, %s3197_s4 }
0x116b   :  { %p2661_p7 = pnand %p2659_p6, %p2656_p5 }
0x116d   :  { %2664 = shalt.err (!%p2661_p7)
}
0x116e   :  { %2181 = dma.vmem_to_hbm [thread:$0]  %s2179_s27, 32, %s3197_s4, [#allocation3]  }
0x116f   :  { %2665 = dma.done.wait [#allocation3], 32  }
0x1170   :  { %2666 = vsyncadd [#allocation3], 4294967264 }
0x1171   :  { %2185 = vsyncpa [#allocation3], 1 }

</bundles_post_ra>
